<compile_context>
chip_gen: v7x
topology: tpu7x:2x2x1
jax: 0.10.0
libtpu: 0.0.40
codegen_flags: <defaults>
</compile_context>

<pallas_src>
import functools

import jax
import jax.numpy as jnp
from jax import lax
from jax.experimental import pallas as pl
from jax.experimental.pallas import tpu as pltpu


def _dilconv_kernel(x_ref, wf_ref, scale_ref, shift_ref, o_ref, *,
                    k, dilation, stride, h_out, w_out, c_out):
    # x_ref:     (NB, H_pad, W_pad, C_in)   zero-padded NHWC input block (f32)
    # wf_ref:    (k*k*C_in, C_out)          folded depthwise*pointwise weights (bf16)
    # scale_ref: (1, C_out)                 folded BN scale  gamma / sqrt(var+eps)
    # shift_ref: (1, C_out)                 folded BN shift  beta - mean*scale
    # o_ref:     (NB, H_out, W_out*C_out)   lane-dense output block
    x = jnp.maximum(x_ref[...], 0.0).astype(jnp.bfloat16)   # ReLU in f32, downcast for MXU
    nb = x.shape[0]
    c_in = x.shape[-1]

    # im2col: k*k statically-shifted taps concatenated along the lane axis.
    # Lane index kk*C_in + ci matches the row order of wf_ref.
    taps = []
    for ky in range(k):
        for kx in range(k):
            y0 = ky * dilation
            x0 = kx * dilation
            taps.append(
                x[:, y0:y0 + (h_out - 1) * stride + 1:stride,
                     x0:x0 + (w_out - 1) * stride + 1:stride, :])
    # TODO(synk): for stride>1 configs, decimate via the BlockSpec/index_map
    # instead of strided in-kernel spatial slices (relayout-heavy); stride==1 here.
    lhs = jnp.concatenate(taps, axis=-1)                     # (NB, H_out, W_out, k*k*C_in)
    lhs = lhs.reshape(nb * h_out * w_out, k * k * c_in)      # leading-dim collapse (free)

    # Depthwise + pointwise as ONE MXU matmul, f32 accumulation.
    y = jnp.dot(lhs, wf_ref[...], preferred_element_type=jnp.float32)
    # Folded BatchNorm (inference / running stats), f32 VPU.
    y = y * scale_ref[...] + shift_ref[...]

    # Lane-dense store: merge (W_out, C_out) into W_out*C_out lanes using
    # supported ops (second-minor index + lane concat).
    y4 = y.reshape(nb, h_out, w_out, c_out)                  # leading-dim split (free)
    merged = jnp.concatenate([y4[:, :, w, :] for w in range(w_out)], axis=-1)
    o_ref[...] = merged.astype(o_ref.dtype)


def _ceil_to(v, m):
    return -(-v // m) * m


def _vmem_bytes(shape, itemsize):
    """Rough VMEM footprint incl. (8,128) vreg padding of the last two dims."""
    s = list(shape)
    s[-1] = _ceil_to(s[-1], 128)
    if len(s) >= 2:
        s[-2] = _ceil_to(s[-2], 8)
    total = itemsize
    for d in s:
        total *= d
    return total


def dil_conv(x, w_dw, w_pw, gamma, beta, running_mean, running_var, *,
             stride, padding, dilation, eps=1e-5):
    """x: (N, C_in, H, W).  w_dw: (C_in, 1, k, k).  w_pw: (C_out, C_in, 1, 1)."""
    n, c_in, h, w = x.shape
    c_out = w_pw.shape[0]
    k = w_dw.shape[-1]

    h_out = (h + 2 * padding - dilation * (k - 1) - 1) // stride + 1
    w_out = (w + 2 * padding - dilation * (k - 1) - 1) // stride + 1
    h_pad = h + 2 * padding
    w_pad = w + 2 * padding
    itemsize = jnp.dtype(x.dtype).itemsize

    # NCHW -> padded NHWC in one fused XLA pass (ReLU(0)==0, so padding before
    # the in-kernel ReLU equals the module's pad-after-ReLU).
    x_p = jnp.pad(jnp.transpose(x, (0, 2, 3, 1)),
                  ((0, 0), (padding, padding), (padding, padding), (0, 0)))

    # Fold depthwise+pointwise weights: W_full[kk*C_in+ci, co] = Wdw[ci,kk]*Wpw[co,ci].
    wdw = w_dw.reshape(c_in, k * k)                           # (C_in, k*k)
    wpw = w_pw.reshape(c_out, c_in)                           # (C_out, C_in)
    w_full = (wdw.T[:, :, None] * wpw.T[None, :, :])          # (k*k, C_in, C_out)
    w_full = w_full.reshape(k * k * c_in, c_out).astype(jnp.bfloat16)

    # Fold BatchNorm (inference mode) into per-C_out lane-oriented scale+shift.
    # TODO(synk): training-mode batch statistics are not computed (eval mode only).
    scale_vec = gamma / jnp.sqrt(running_var + eps)
    shift_vec = beta - running_mean * scale_vec
    scale = scale_vec.reshape(1, c_out).astype(jnp.float32)
    shift = shift_vec.reshape(1, c_out).astype(jnp.float32)

    # Batch-block sizing: count double-buffered I/O blocks AND the in-kernel
    # temporaries with (8,128) vreg padding; stay under a conservative budget
    # that fits v5e's 16 MiB scoped default and v7x's smaller VMEM.
    per_sample = (
        2 * _vmem_bytes((h_pad, w_pad, c_in), 4)                  # input block (dbl-buffered)
        + 2 * _vmem_bytes((h_out, w_out * c_out), itemsize)       # output block (dbl-buffered)
        + _vmem_bytes((h_pad, w_pad, c_in), 2)                    # bf16 ReLU copy
        + 2 * _vmem_bytes((h_out, w_out, k * k * c_in), 2)        # taps + im2col (bf16)
        + _vmem_bytes((h_out * w_out, c_out), 4)                  # f32 matmul accumulator
    )
    budget = 12 * 1024 * 1024
    nb = int(max(1, min(n, budget // per_sample)))
    if n >= 2:
        nb = int(min(nb, pl.cdiv(n, 2)))   # >=2 grid steps: megacore / both v7x TCs busy
    grid_steps = pl.cdiv(n, nb)            # robust to N not divisible by nb

    kernel = functools.partial(_dilconv_kernel, k=k, dilation=dilation,
                               stride=stride, h_out=h_out, w_out=w_out,
                               c_out=c_out)

    m_rows = n * h_out * w_out
    cost = pl.CostEstimate(
        flops=(2 * m_rows * (k * k * c_in) * c_out          # matmul
               + 3 * m_rows * c_out                         # BN scale+shift
               + n * h_pad * w_pad * c_in),                 # ReLU
        transcendentals=0,
        bytes_accessed=(x_p.size * itemsize + w_full.size * 2
                        + (scale.size + shift.size) * 4
                        + m_rows * c_out * itemsize))

    out3 = pl.pallas_call(
        kernel,
        out_shape=jax.ShapeDtypeStruct((n, h_out, w_out * c_out), x.dtype),
        grid_spec=pltpu.PrefetchScalarGridSpec(
            num_scalar_prefetch=0,
            grid=(grid_steps,),
            in_specs=[
                pl.BlockSpec((nb, h_pad, w_pad, c_in), lambda i: (i, 0, 0, 0)),
                pl.BlockSpec((k * k * c_in, c_out), lambda i: (0, 0)),   # folded weights
                pl.BlockSpec((1, c_out), lambda i: (0, 0)),              # BN scale
                pl.BlockSpec((1, c_out), lambda i: (0, 0)),              # BN shift
            ],
            out_specs=pl.BlockSpec((nb, h_out, w_out * c_out),
                                   lambda i: (i, 0, 0)),
        ),
        compiler_params=pltpu.CompilerParams(
            dimension_semantics=("parallel",),
            vmem_limit_bytes=32 * 1024 * 1024),
        cost_estimate=cost,
    )(x_p, w_full, scale, shift)

    # Free reshape back to NHWC, then one transpose to the module's NCHW layout.
    out = out3.reshape(n, h_out, w_out, c_out)
    return jnp.transpose(out, (0, 3, 1, 2))


def _reference(x, w_dw, w_pw, gamma, beta, mean, var, *,
               stride, padding, dilation, eps=1e-5):
    c_in = x.shape[1]
    y = jnp.maximum(x, 0.0)
    y = lax.conv_general_dilated(
        y, w_dw, window_strides=(stride, stride),
        padding=[(padding, padding), (padding, padding)],
        rhs_dilation=(dilation, dilation),
        dimension_numbers=("NCHW", "OIHW", "NCHW"),
        feature_group_count=c_in)
    y = lax.conv_general_dilated(
        y, w_pw, window_strides=(1, 1), padding="VALID",
        dimension_numbers=("NCHW", "OIHW", "NCHW"))
    scale = gamma / jnp.sqrt(var + eps)
    shift = beta - mean * scale
    return y * scale[None, :, None, None] + shift[None, :, None, None]


if __name__ == "__main__":
    key = jax.random.PRNGKey(0)
    ks = jax.random.split(key, 7)

    # dil_conv_3x3 configuration (kernel=3, stride=1, padding=2, dilation=2).
    N, C_in, C_out, H, W = 2, 16, 32, 16, 16
    K, STRIDE, PADDING, DILATION = 3, 1, 2, 2

    x = jax.random.normal(ks[0], (N, C_in, H, W), dtype=jnp.float32)
    w_dw = jax.random.normal(ks[1], (C_in, 1, K, K), dtype=jnp.float32) * 0.2
    w_pw = jax.random.normal(ks[2], (C_out, C_in, 1, 1), dtype=jnp.float32) * 0.2
    gamma = jax.random.normal(ks[3], (C_out,), dtype=jnp.float32) * 0.1 + 1.0
    beta = jax.random.normal(ks[4], (C_out,), dtype=jnp.float32) * 0.1
    running_mean = jax.random.normal(ks[5], (C_out,), dtype=jnp.float32) * 0.1
    running_var = jnp.abs(jax.random.normal(ks[6], (C_out,), dtype=jnp.float32)) * 0.5 + 0.5

    out = dil_conv(x, w_dw, w_pw, gamma, beta, running_mean, running_var,
                   stride=STRIDE, padding=PADDING, dilation=DILATION)
    out = jax.block_until_ready(out)

    ref = _reference(x, w_dw, w_pw, gamma, beta, running_mean, running_var,
                     stride=STRIDE, padding=PADDING, dilation=DILATION)
    assert out.shape == ref.shape, (out.shape, ref.shape)
    # Tolerance reflects bf16 MXU operands with f32 accumulation (expected
    # error is a few 1e-3 at these magnitudes).
    assert jnp.allclose(out, ref, atol=2e-2, rtol=2e-2), \
        f"mismatch vs reference, max abs err={float(jnp.max(jnp.abs(out - ref)))}"

    print("KERNEL_OK")
</pallas_src>

<mosaic_0001>
module attributes {stable_mosaic.version = 11 : i64} {
  func.func @_dilconv_kernel(%arg0: i32, %arg1: memref<1x20x20x16xf32, #tpu.memory_space<vmem>>, %arg2: memref<144x32xbf16, #tpu.memory_space<vmem>>, %arg3: memref<1x32xf32, #tpu.memory_space<vmem>>, %arg4: memref<1x32xf32, #tpu.memory_space<vmem>>, %arg5: memref<1x16x512xf32, #tpu.memory_space<vmem>>) attributes {dimension_semantics = [#tpu.dimension_semantics<parallel>], iteration_bounds = array<i64: 2>, scalar_prefetch = 0 : i64, scratch_operands = 0 : i64, tpu.core_type = #tpu.core_type<tc>, window_params = [{transform_indices = @transform_0, window_bounds = array<i64: 1, 20, 20, 16>}, {pipeline_mode = #tpu.pipeline_mode<synchronous>, transform_indices = @transform_1, window_bounds = array<i64: 144, 32>}, {pipeline_mode = #tpu.pipeline_mode<synchronous>, transform_indices = @transform_2, window_bounds = array<i64: 1, 32>}, {pipeline_mode = #tpu.pipeline_mode<synchronous>, transform_indices = @transform_3, window_bounds = array<i64: 1, 32>}, {transform_indices = @transform_4, window_bounds = array<i64: 1, 16, 512>}]} {
    %c0 = arith.constant 0 : index
    %c0_0 = arith.constant 0 : index
    %c0_1 = arith.constant 0 : index
    %c0_2 = arith.constant 0 : index
    %0 = vector.load %arg1[%c0, %c0_0, %c0_1, %c0_2] : memref<1x20x20x16xf32, #tpu.memory_space<vmem>>, vector<1x20x20x16xf32>
    %cst = arith.constant 0.000000e+00 : f32
    %1 = vector.broadcast %cst : f32 to vector<1x20x20x16xf32>
    %2 = arith.maximumf %0, %1 : vector<1x20x20x16xf32>
    %3 = arith.truncf %2 : vector<1x20x20x16xf32> to vector<1x20x20x16xbf16>
    %4 = vector.extract_strided_slice %3 {offsets = [0, 0, 0, 0], sizes = [1, 16, 16, 16], strides = [1, 1, 1, 1]} : vector<1x20x20x16xbf16> to vector<1x16x16x16xbf16>
    %5 = vector.extract_strided_slice %3 {offsets = [0, 0, 2, 0], sizes = [1, 16, 16, 16], strides = [1, 1, 1, 1]} : vector<1x20x20x16xbf16> to vector<1x16x16x16xbf16>
    %6 = vector.extract_strided_slice %3 {offsets = [0, 0, 4, 0], sizes = [1, 16, 16, 16], strides = [1, 1, 1, 1]} : vector<1x20x20x16xbf16> to vector<1x16x16x16xbf16>
    %7 = vector.extract_strided_slice %3 {offsets = [0, 2, 0, 0], sizes = [1, 16, 16, 16], strides = [1, 1, 1, 1]} : vector<1x20x20x16xbf16> to vector<1x16x16x16xbf16>
    %8 = vector.extract_strided_slice %3 {offsets = [0, 2, 2, 0], sizes = [1, 16, 16, 16], strides = [1, 1, 1, 1]} : vector<1x20x20x16xbf16> to vector<1x16x16x16xbf16>
    %9 = vector.extract_strided_slice %3 {offsets = [0, 2, 4, 0], sizes = [1, 16, 16, 16], strides = [1, 1, 1, 1]} : vector<1x20x20x16xbf16> to vector<1x16x16x16xbf16>
    %10 = vector.extract_strided_slice %3 {offsets = [0, 4, 0, 0], sizes = [1, 16, 16, 16], strides = [1, 1, 1, 1]} : vector<1x20x20x16xbf16> to vector<1x16x16x16xbf16>
    %11 = vector.extract_strided_slice %3 {offsets = [0, 4, 2, 0], sizes = [1, 16, 16, 16], strides = [1, 1, 1, 1]} : vector<1x20x20x16xbf16> to vector<1x16x16x16xbf16>
    %12 = vector.extract_strided_slice %3 {offsets = [0, 4, 4, 0], sizes = [1, 16, 16, 16], strides = [1, 1, 1, 1]} : vector<1x20x20x16xbf16> to vector<1x16x16x16xbf16>
    %13 = tpu.concatenate %4, %5, %6, %7, %8, %9, %10, %11, %12 in 3 : vector<1x16x16x16xbf16>, vector<1x16x16x16xbf16>, vector<1x16x16x16xbf16>, vector<1x16x16x16xbf16>, vector<1x16x16x16xbf16>, vector<1x16x16x16xbf16>, vector<1x16x16x16xbf16>, vector<1x16x16x16xbf16>, vector<1x16x16x16xbf16> -> vector<1x16x16x144xbf16>
    %14 = vector.shape_cast %13 : vector<1x16x16x144xbf16> to vector<256x144xbf16>
    %c0_3 = arith.constant 0 : index
    %c0_4 = arith.constant 0 : index
    %15 = vector.load %arg2[%c0_3, %c0_4] : memref<144x32xbf16, #tpu.memory_space<vmem>>, vector<144x32xbf16>
    %cst_5 = arith.constant dense<0.000000e+00> : vector<256x32xf32>
    %16 = tpu.matmul %14, %15, %cst_5 {dimension_numbers = #tpu.dot_dimension_numbers<[1], [0], [0], [1], [0, 0, 1, 1], [], []>} : vector<256x144xbf16>, vector<144x32xbf16>, vector<256x32xf32> -> vector<256x32xf32>
    %c0_6 = arith.constant 0 : index
    %c0_7 = arith.constant 0 : index
    %17 = vector.load %arg3[%c0_6, %c0_7] : memref<1x32xf32, #tpu.memory_space<vmem>>, vector<1x32xf32>
    %18 = vector.broadcast %17 : vector<1x32xf32> to vector<256x32xf32>
    %19 = arith.mulf %16, %18 : vector<256x32xf32>
    %c0_8 = arith.constant 0 : index
    %c0_9 = arith.constant 0 : index
    %20 = vector.load %arg4[%c0_8, %c0_9] : memref<1x32xf32, #tpu.memory_space<vmem>>, vector<1x32xf32>
    %21 = vector.broadcast %20 : vector<1x32xf32> to vector<256x32xf32>
    %22 = arith.addf %19, %21 : vector<256x32xf32>
    %23 = vector.shape_cast %22 : vector<256x32xf32> to vector<1x16x16x32xf32>
    %24 = vector.extract_strided_slice %23 {offsets = [0, 0, 0, 0], sizes = [1, 16, 1, 32], strides = [1, 1, 1, 1]} : vector<1x16x16x32xf32> to vector<1x16x1x32xf32>
    %25 = vector.shape_cast %24 : vector<1x16x1x32xf32> to vector<1x16x32xf32>
    %26 = vector.extract_strided_slice %23 {offsets = [0, 0, 1, 0], sizes = [1, 16, 1, 32], strides = [1, 1, 1, 1]} : vector<1x16x16x32xf32> to vector<1x16x1x32xf32>
    %27 = vector.shape_cast %26 : vector<1x16x1x32xf32> to vector<1x16x32xf32>
    %28 = vector.extract_strided_slice %23 {offsets = [0, 0, 2, 0], sizes = [1, 16, 1, 32], strides = [1, 1, 1, 1]} : vector<1x16x16x32xf32> to vector<1x16x1x32xf32>
    %29 = vector.shape_cast %28 : vector<1x16x1x32xf32> to vector<1x16x32xf32>
    %30 = vector.extract_strided_slice %23 {offsets = [0, 0, 3, 0], sizes = [1, 16, 1, 32], strides = [1, 1, 1, 1]} : vector<1x16x16x32xf32> to vector<1x16x1x32xf32>
    %31 = vector.shape_cast %30 : vector<1x16x1x32xf32> to vector<1x16x32xf32>
    %32 = vector.extract_strided_slice %23 {offsets = [0, 0, 4, 0], sizes = [1, 16, 1, 32], strides = [1, 1, 1, 1]} : vector<1x16x16x32xf32> to vector<1x16x1x32xf32>
    %33 = vector.shape_cast %32 : vector<1x16x1x32xf32> to vector<1x16x32xf32>
    %34 = vector.extract_strided_slice %23 {offsets = [0, 0, 5, 0], sizes = [1, 16, 1, 32], strides = [1, 1, 1, 1]} : vector<1x16x16x32xf32> to vector<1x16x1x32xf32>
    %35 = vector.shape_cast %34 : vector<1x16x1x32xf32> to vector<1x16x32xf32>
    %36 = vector.extract_strided_slice %23 {offsets = [0, 0, 6, 0], sizes = [1, 16, 1, 32], strides = [1, 1, 1, 1]} : vector<1x16x16x32xf32> to vector<1x16x1x32xf32>
    %37 = vector.shape_cast %36 : vector<1x16x1x32xf32> to vector<1x16x32xf32>
    %38 = vector.extract_strided_slice %23 {offsets = [0, 0, 7, 0], sizes = [1, 16, 1, 32], strides = [1, 1, 1, 1]} : vector<1x16x16x32xf32> to vector<1x16x1x32xf32>
    %39 = vector.shape_cast %38 : vector<1x16x1x32xf32> to vector<1x16x32xf32>
    %40 = vector.extract_strided_slice %23 {offsets = [0, 0, 8, 0], sizes = [1, 16, 1, 32], strides = [1, 1, 1, 1]} : vector<1x16x16x32xf32> to vector<1x16x1x32xf32>
    %41 = vector.shape_cast %40 : vector<1x16x1x32xf32> to vector<1x16x32xf32>
    %42 = vector.extract_strided_slice %23 {offsets = [0, 0, 9, 0], sizes = [1, 16, 1, 32], strides = [1, 1, 1, 1]} : vector<1x16x16x32xf32> to vector<1x16x1x32xf32>
    %43 = vector.shape_cast %42 : vector<1x16x1x32xf32> to vector<1x16x32xf32>
    %44 = vector.extract_strided_slice %23 {offsets = [0, 0, 10, 0], sizes = [1, 16, 1, 32], strides = [1, 1, 1, 1]} : vector<1x16x16x32xf32> to vector<1x16x1x32xf32>
    %45 = vector.shape_cast %44 : vector<1x16x1x32xf32> to vector<1x16x32xf32>
    %46 = vector.extract_strided_slice %23 {offsets = [0, 0, 11, 0], sizes = [1, 16, 1, 32], strides = [1, 1, 1, 1]} : vector<1x16x16x32xf32> to vector<1x16x1x32xf32>
    %47 = vector.shape_cast %46 : vector<1x16x1x32xf32> to vector<1x16x32xf32>
    %48 = vector.extract_strided_slice %23 {offsets = [0, 0, 12, 0], sizes = [1, 16, 1, 32], strides = [1, 1, 1, 1]} : vector<1x16x16x32xf32> to vector<1x16x1x32xf32>
    %49 = vector.shape_cast %48 : vector<1x16x1x32xf32> to vector<1x16x32xf32>
    %50 = vector.extract_strided_slice %23 {offsets = [0, 0, 13, 0], sizes = [1, 16, 1, 32], strides = [1, 1, 1, 1]} : vector<1x16x16x32xf32> to vector<1x16x1x32xf32>
    %51 = vector.shape_cast %50 : vector<1x16x1x32xf32> to vector<1x16x32xf32>
    %52 = vector.extract_strided_slice %23 {offsets = [0, 0, 14, 0], sizes = [1, 16, 1, 32], strides = [1, 1, 1, 1]} : vector<1x16x16x32xf32> to vector<1x16x1x32xf32>
    %53 = vector.shape_cast %52 : vector<1x16x1x32xf32> to vector<1x16x32xf32>
    %54 = vector.extract_strided_slice %23 {offsets = [0, 0, 15, 0], sizes = [1, 16, 1, 32], strides = [1, 1, 1, 1]} : vector<1x16x16x32xf32> to vector<1x16x1x32xf32>
    %55 = vector.shape_cast %54 : vector<1x16x1x32xf32> to vector<1x16x32xf32>
    %56 = tpu.concatenate %25, %27, %29, %31, %33, %35, %37, %39, %41, %43, %45, %47, %49, %51, %53, %55 in 2 : vector<1x16x32xf32>, vector<1x16x32xf32>, vector<1x16x32xf32>, vector<1x16x32xf32>, vector<1x16x32xf32>, vector<1x16x32xf32>, vector<1x16x32xf32>, vector<1x16x32xf32>, vector<1x16x32xf32>, vector<1x16x32xf32>, vector<1x16x32xf32>, vector<1x16x32xf32>, vector<1x16x32xf32>, vector<1x16x32xf32>, vector<1x16x32xf32>, vector<1x16x32xf32> -> vector<1x16x512xf32>
    %c0_10 = arith.constant 0 : index
    %c0_11 = arith.constant 0 : index
    %c0_12 = arith.constant 0 : index
    %57 = vector.load %arg5[%c0_10, %c0_11, %c0_12] : memref<1x16x512xf32, #tpu.memory_space<vmem>>, vector<1x16x512xf32>
    tpu.vector_store %arg5[%c0_10, %c0_11, %c0_12], %56 {strides = array<i32>} : memref<1x16x512xf32, #tpu.memory_space<vmem>>, vector<1x16x512xf32>,
    return
  }
  func.func @transform_0(%arg0: i32) -> (i32, i32, i32, i32) {
    %c0_i32 = arith.constant 0 : i32
    %c0_i32_0 = arith.constant 0 : i32
    %c0_i32_1 = arith.constant 0 : i32
    %c0_i32_2 = arith.constant 0 : i32
    return %arg0, %c0_i32, %c0_i32_0, %c0_i32_1 : i32, i32, i32, i32
  }
  func.func @transform_1(%arg0: i32) -> (i32, i32) {
    %c0_i32 = arith.constant 0 : i32
    %c0_i32_0 = arith.constant 0 : i32
    %c0_i32_1 = arith.constant 0 : i32
    return %c0_i32, %c0_i32_0 : i32, i32
  }
  func.func @transform_2(%arg0: i32) -> (i32, i32) {
    %c0_i32 = arith.constant 0 : i32
    %c0_i32_0 = arith.constant 0 : i32
    %c0_i32_1 = arith.constant 0 : i32
    return %c0_i32, %c0_i32_0 : i32, i32
  }
  func.func @transform_3(%arg0: i32) -> (i32, i32) {
    %c0_i32 = arith.constant 0 : i32
    %c0_i32_0 = arith.constant 0 : i32
    %c0_i32_1 = arith.constant 0 : i32
    return %c0_i32, %c0_i32_0 : i32, i32
  }
  func.func @transform_4(%arg0: i32) -> (i32, i32, i32) {
    %c0_i32 = arith.constant 0 : i32
    %c0_i32_0 = arith.constant 0 : i32
    %c0_i32_1 = arith.constant 0 : i32
    return %arg0, %c0_i32, %c0_i32_0 : i32, i32, i32
  }
}

</mosaic_0001>

<bundles_post_ra>
// kernel: tpu_custom_call.1
= control target key start
LH: loop header
LB: loop body
LE: loop exit
PB: predicated region body
PF: predicated region fallthrough
CT: control target
= control target key end

     0   :  { %9 = vsyncpa [#allocation3], 0  ;;  %s4253_s0 = inlined_call_operand.vmem [shape: f32[2,20,20,16], index: 0, kind: input, shape index: {}]   ;;  %s4254_s1 = inlined_call_operand.vmem [shape: bf16[144,32], index: 1, kind: input, shape index: {}]   ;;  %s4255_s2 = inlined_call_operand.vmem [shape: f32[1,32], index: 2, kind: input, shape index: {}]   ;;  %s4256_s3 = inlined_call_operand.vmem [shape: f32[1,32], index: 3, kind: input, shape index: {}]   ;;  %s4257_s4 = inlined_call_operand.hbm [shape: f32[2,16,512], index: 4, kind: output, shape index: {}]  }
   0x1   :  { %11 = vsyncpa [#allocation3 + $0x1], 0  ;;  %s2256_s15 = smov 0   ;;  %s2258_s16 = smov 0  }
   0x2   :  { %s2260_s17 = smov 0   ;;  %s2262_s18 = smov 0  }
   0x3 LB: > { %s2277_s19 = sadd.s32 4294967295, %s2219_s18   ;;  %s2040_s20 = sadd.s32 4294967294, %s2219_s18   ;;  %s2219_s18 = sphi %s2262_s18, %s4263_s18   ;;  %s2215_s17 = sphi %s2260_s17, %s4262_s17   ;;  %s2211_s16 = sphi %s2258_s16, %s4261_s16   ;;  %s2207_s15 = sphi %s2256_s15, %s4260_s15  }
   0x4   : > { %s2281_s21 = sadd.s32 1, %s2219_s18   ;;  %s113_s22 = sadd.s32 1, %s2215_s17 }
   0x5   : > { %s110_s23 = ssub.s32 %s2219_s18, %s2281_s21  ;;  %p123_p0 = scmp.ne.s32.totalorder %s2215_s17, %s2211_s16 }
   0x6   : > { %p111_p1 = scmp.eq.s32.totalorder %s110_s23, 0  ;;  %p124_p2 = scmp.eq.s32.totalorder %s2277_s19, 1 }
   0x7   : > { %p129_p3 = scmp.ne.s32.totalorder %s2211_s16, %s2207_s15  ;;  %p130_p4 = scmp.eq.s32.totalorder %s2040_s20, 1 }
   0x8   : > { %s2292_s24 = scalar_select %p111_p1, %s2215_s17, %s113_s22  }
   0x9   : > { %p2294_p5 = por %p124_p2, %p123_p0  ;;  %p2298_p6 = por %p130_p4, %p129_p3 }
   0xa   : > { %p2043_p7 = scmp.ge.s32.totalorder %s2219_s18, 1  ;;  %p165_p8 = scmp.lt.s32.totalorder %s2219_s18, 3 }
   0xc   : > { %p166_p9 = pnand %p2043_p7, %p165_p8 }
   0xd   : > { %p191_p10 = scmp.lt.s32.totalorder (!%p166_p9), %s2277_s19, 1  ;;  %v2146_v0 = vld [vmem:[%s4254_s1] sm:$0xff] (!%p166_p9)   ;;  %v2221_v1 = vmov (!%p166_p9), 0   ;;  %v2147_v2 = vld [vmem:[%s4254_s1 + $0x8] sm:$0xff] (!%p166_p9)   ;;  %v2148_v3 = vld [vmem:[%s4254_s1 + $0x10] sm:$0xff] (!%p166_p9)   ;;  %vm470_vm0 = vcmask (!%p166_p9), 1045504  }
   0xe   : > { %169 = sbr.rel (%p166_p9) target bundleno = 760 (0x2f8), region = 36  ;;  %1126 = vmatprep.subr.bf16.mxu0 (!%p166_p9), %v2221_v1  ;;  %2079 = vmatprep.subr.bf16.mxu1 (!%p166_p9), %v2221_v1  ;;  %v2149_v23 = vld [vmem:[%s4254_s1 + $0x18] sm:$0xff] (!%p166_p9)   ;;  %s2222_s14 = smov (!%p166_p9), 48   ;;  %vm389_vm1 = vcmask (!%p166_p9), 1046528   ;;  %v2150_v41 = vld [vmem:[%s4254_s1 + $0x20] sm:$0xff] (!%p166_p9)   ;;  %vm743_vm2 = vcmask (!%p166_p9), 130048  }
   0xf   : > { %1127 = vmatpush1.bf16.msra.mxu0 (!%p166_p9), %v2146_v0  ;;  %2088 = vmatpush1.bf16.msra.mxu1 (!%p166_p9), %v2146_v0  ;;  %s2223_s23 = smov (!%p166_p9), 32   ;;  %s2224_s27 = smov (!%p166_p9), 16   ;;  %vm792_vm3 = vcmask (!%p166_p9), 261120   ;;  %vm825_vm4 = vcmask (!%p166_p9), 392192   ;;  %vm858_vm5 = vcmask (!%p166_p9), 523264   ;;  %vm891_vm6 = vcmask (!%p166_p9), 654336  }
  0x10   : > { %1128 = vmatprep.subr.bf16.mxu0 (!%p166_p9), %v2221_v1  ;;  %2080 = vmatprep.subr.bf16.mxu1 (!%p166_p9), %v2221_v1  ;;  %s2225_s28 = smov (!%p166_p9), 64   ;;  %s2226_s5 = smov (!%p166_p9), 80   ;;  %vm924_vm7 = vcmask (!%p166_p9), 785408   ;;  %vm957_vm8 = vcmask (!%p166_p9), 916480   ;;  %vm1382_vm9 = vcmask (!%p166_p9), 1041409   ;;  %vm1385_vm10 = vcmask (!%p166_p9), 1042434  }
  0x11   : > { %s2227_s8 = smov (!%p166_p9), 96   ;;  %s2228_s12 = smov (!%p166_p9), 112   ;;  %vm1388_vm11 = vcmask (!%p166_p9), 1043459   ;;  %vm1391_vm12 = vcmask (!%p166_p9), 1044484   ;;  %vm1394_vm13 = vcmask (!%p166_p9), 1045509   ;;  %vm1397_vm14 = vcmask (!%p166_p9), 1046534  }
  0x12   : > { %vm1400_vm15 = vcmask (!%p166_p9), 1047559   ;;  %s188_s7 = sand.u32 (!%p166_p9), 1, %s2211_s16  }
  0x13   : > { %1129 = vmatpush1.bf16.msra.mxu0 (!%p166_p9), %v2147_v2  ;;  %2089 = vmatpush1.bf16.msra.mxu1 (!%p166_p9), %v2147_v2  ;;  %s2044_s9 = sshll.u32 (!%p166_p9), %s188_s7, 6  ;;  %s4211_s20 = scalar_lea.sflag (!%p166_p9), [#allocation3], %s188_s7 }
  0x14   : > { %1130 = vmatprep.subr.bf16.mxu0 (!%p166_p9), %v2221_v1  ;;  %2081 = vmatprep.subr.bf16.mxu1 (!%p166_p9), %v2221_v1 }
  0x15   : > { %s192_s29 = scalar_select %p191_p10, %s2277_s19, 1 }
  0x17   : > { %s2097_s6 = smul.u32 480, %s192_s29  ;;  %1131 = vmatpush1.bf16.msra.mxu0 %v2148_v3  ;;  %2090 = vmatpush1.bf16.msra.mxu1 %v2148_v3 }
  0x18   : > { %1132 = vmatprep.subr.bf16.mxu0 %v2221_v1  ;;  %2082 = vmatprep.subr.bf16.mxu1 %v2221_v1 }
  0x19   : > { %s2322_s11 = scalar_lea.vmem %s4253_s0, %s2097_s6 }
  0x1a   : > { %v227_v4 = vld [vmem:[%s2322_s11 + $0xf0] sm:$0xff]  ;;  %v228_v5 = vld [vmem:[%s2322_s11 + $0xf8] sm:$0xff]  ;;  %v197_v11 = vld [vmem:[%s2322_s11] sm:$0xff] }
  0x1b   : > { %v203_v6 = vld [vmem:[%s2322_s11 + $0x30] sm:$0xff]  ;;  %v287_v7 = vmax.f32 %v227_v4, 0.0  ;;  %v288_v8 = vmax.f32 %v228_v5, 0.0  ;;  %v204_v9 = vld [vmem:[%s2322_s11 + $0x38] sm:$0xff]  ;;  %v198_v12 = vld [vmem:[%s2322_s11 + $0x8] sm:$0xff]  ;;  %v257_v15 = vmax.f32 %v197_v11, 0.0  ;;  %1133 = vmatpush1.bf16.msra.mxu0 %v2149_v23  ;;  %2091 = vmatpush1.bf16.msra.mxu1 %v2149_v23 }
  0x1c   : > { %v263_v10 = vmax.f32 %v203_v6, 0.0  ;;  %v264_v13 = vmax.f32 %v204_v9, 0.0  ;;  %v199_v14 = vld [vmem:[%s2322_s11 + $0x10] sm:$0xf]  ;;  %v258_v16 = vmax.f32 %v198_v12, 0.0  ;;  %v221_v17 = vld [vmem:[%s2322_s11 + $0xc0] sm:$0xff]  ;;  %1134 = vmatprep.subr.bf16.mxu0 %v2221_v1  ;;  %2083 = vmatprep.subr.bf16.mxu1 %v2221_v1 }
  0x1d   : > { %v2334_v18 = vpack.c.bf16 %v288_v8, %v287_v7  ;;  %v259_v19 = vmax.f32 %v199_v14, 0.0  ;;  %v222_v20 = vld [vmem:[%s2322_s11 + $0xc8] sm:$0xff]  ;;  %v223_v21 = vld [vmem:[%s2322_s11 + $0xd0] sm:$0xf]  ;;  %v281_v22 = vmax.f32 %v221_v17, 0.0  ;;  %v233_v48 = vld [vmem:[%s2322_s11 + $0x120] sm:$0xff] }
  0x1e   : > { %v2341_v24 = vpack.c.bf16 %v264_v13, %v263_v10  ;;  %v2343_v25 = vpack.c.bf16 %v258_v16, %v257_v15  ;;  %v282_v26 = vmax.f32 %v222_v20, 0.0  ;;  %v283_v27 = vmax.f32 %v223_v21, 0.0  ;;  %v229_v28 = vld [vmem:[%s2322_s11 + $0x100] sm:$0xf]  ;;  %v234_v49 = vld [vmem:[%s2322_s11 + $0x128] sm:$0xff]  ;;  %v224_v0 = vld [vmem:[%s2322_s11 + $0xd8] sm:$0xff] }
  0x1f   : > { %v205_v29 = vld [vmem:[%s2322_s11 + $0x40] sm:$0xf]  ;;  %569 = vrot.lane.b32.xlu1 %v2334_v18, %s2222_s14  ;;  %v318_v30 = vpack.c.bf16 %v259_v19, %v259_v19  ;;  %v289_v31 = vmax.f32 %v229_v28, 0.0  ;;  %v420_v50 = vrot.slane %v2334_v18, 1  ;;  %v210_v53 = vld [vmem:[%s2322_s11 + $0x68] sm:$0xff]  ;;  %1135 = vmatpush1.bf16.msra.mxu0 %v2150_v41  ;;  %v293_v59 = vmax.f32 %v233_v48, 0.0 }
  0x20   : > { %v265_v32 = vmax.f32 %v205_v29, 0.0  ;;  %553 = vrot.lane.b32.xlu0 %v2341_v24, %s2222_s14  ;;  %v471_v33 = vrot.slane %v2343_v25, 2  ;;  %v390_v34 = vrot.slane %v2343_v25, 1  ;;  %v2355_v35 = vpack.c.bf16 %v282_v26, %v281_v22  ;;  %v209_v52 = vld [vmem:[%s2322_s11 + $0x60] sm:$0xff]  ;;  %v235_v58 = vld [vmem:[%s2322_s11 + $0x130] sm:$0xf]  ;;  %2092 = vmatpush1.bf16.msra.mxu1 %v2150_v41 }
  0x21   : > { %v334_v36 = vpack.c.bf16 %v283_v27, %v283_v27  ;;  %v472_v37 = vrot.slane %v318_v30, 2  ;;  %v391_v38 = vrot.slane %v318_v30, 1  ;;  %v2357_v39 = vpack.c.bf16 %v289_v31, %v289_v31  ;;  %v211_v61 = vld [vmem:[%s2322_s11 + $0x70] sm:$0xf]  ;;  %1136 = vmatprep.subr.bf16.mxu0 %v2221_v1  ;;  %2084 = vmatprep.subr.bf16.mxu1 %v2221_v1  ;;  %v225_v2 = vld [vmem:[%s2322_s11 + $0xe0] sm:$0xff]  ;;  %v200_v8 = vld [vmem:[%s2322_s11 + $0x18] sm:$0xff] }
  0x22   : > { %v2359_v40 = vpack.c.bf16 %v265_v32, %v265_v32  ;;  %v495_v42 = vrot.slane %v2355_v35, 2  ;;  %v414_v44 = vrot.slane %v2355_v35, 1  ;;  %v396_v56 = vrot.slane %v2341_v24, 1  ;;  %v226_v7 = vld [vmem:[%s2322_s11 + $0xe8] sm:$0xf]  ;;  %v201_v13 = vld [vmem:[%s2322_s11 + $0x20] sm:$0xff] }
  0x23   : > { %v496_v43 = vrot.slane %v334_v36, 2  ;;  %v415_v45 = vrot.slane %v334_v36, 1  ;;  %v473_v46 = vsel %vm470_vm0, %v471_v33, %v472_v37  ;;  %v392_v47 = vsel %vm389_vm1, %v390_v34, %v391_v38  ;;  %v202_v14 = vld [vmem:[%s2322_s11 + $0x28] sm:$0xf]  ;;  %v207_v48 = vld [vmem:[%s2322_s11 + $0x50] sm:$0xff] }
  0x24   : > { %519 = vrot.lane.b32.xlu1 %v473_v46, %s2223_s23  ;;  %438 = vrot.lane.b32.xlu0 %v392_v47, %s2224_s27  ;;  %v421_v51 = vrot.slane %v2357_v39, 1  ;;  %v397_v57 = vrot.slane %v2359_v40, 1  ;;  %v294_v60 = vmax.f32 %v234_v49, 0.0  ;;  %v269_v62 = vmax.f32 %v209_v52, 0.0  ;;  %v2151_v30 = vld [vmem:[%s4254_s1 + $0x28] sm:$0xff]  }
  0x25   : > { %v2379_v54 = vsel %vm470_vm0, %v495_v42, %v496_v43  ;;  %v2382_v55 = vsel %vm389_vm1, %v414_v44, %v415_v45  ;;  %v270_v63 = vmax.f32 %v210_v53, 0.0  ;;  %v501_v4 = vrot.slane %v2334_v18, 2  ;;  %1137 = vmatpush1.bf16.msra.mxu0 %v2151_v30  ;;  %2093 = vmatpush1.bf16.msra.mxu1 %v2151_v30  ;;  %v230_v43 = vld [vmem:[%s2322_s11 + $0x108] sm:$0xff]  ;;  %v231_v44 = vld [vmem:[%s2322_s11 + $0x110] sm:$0xff]  ;;  %v208_v52 = vld [vmem:[%s2322_s11 + $0x58] sm:$0xf] }
  0x26   : > { %v2397_v3 = vsel %vm389_vm1, %v420_v50, %v421_v51  ;;  %v502_v5 = vrot.slane %v2357_v39, 2  ;;  %v295_v6 = vmax.f32 %v235_v58, 0.0  ;;  %v2404_v9 = vsel %vm389_vm1, %v396_v56, %v397_v57  ;;  %1138 = vmatprep.subr.bf16.mxu0 %v2221_v1  ;;  %2085 = vmatprep.subr.bf16.mxu1 %v2221_v1  ;;  %v206_v47 = vld [vmem:[%s2322_s11 + $0x48] sm:$0xff]  ;;  %v232_v51 = vld [vmem:[%s2322_s11 + $0x118] sm:$0xf] }
  0x27   : > { %v477_v10 = vrot.slane %v2341_v24, 2  ;;  %v478_v11 = vrot.slane %v2359_v40, 2  ;;  %v271_v12 = vmax.f32 %v211_v61, 0.0  ;;  %v2410_v15 = vpack.c.bf16 %v294_v60, %v293_v59  ;;  %v2152_v40 = vld [vmem:[%s4254_s1 + $0x30] sm:$0xff]   ;;  %v2153_v53 = vld [vmem:[%s4254_s1 + $0x38] sm:$0xff]  }
  0x28   : > { %535 = vrot.lane.b32.xlu1 %v2379_v54, %s2223_s23  ;;  %454 = vrot.lane.b32.xlu0 %v2382_v55, %s2224_s27  ;;  %v2412_v16 = vpack.c.bf16 %v270_v63, %v269_v62  ;;  %v284_v17 = vmax.f32 %v224_v0, 0.0  ;;  %v285_v19 = vmax.f32 %v225_v2, 0.0  ;;  %v286_v20 = vmax.f32 %v226_v7, 0.0 }
  0x29   : > { %v2418_v21 = vpack.c.bf16 %v295_v6, %v295_v6  ;;  %v260_v22 = vmax.f32 %v200_v8, 0.0  ;;  %v261_v23 = vmax.f32 %v201_v13, 0.0  ;;  %v262_v26 = vmax.f32 %v202_v14, 0.0  ;;  %1139 = vmatpush1.bf16.msra.mxu0 %v2152_v40  ;;  %2094 = vmatpush1.bf16.msra.mxu1 %v2152_v40 }
  0x2a   : > { %v2421_v27 = vsel %vm470_vm0, %v501_v4, %v502_v5  ;;  %v2424_v28 = vsel %vm470_vm0, %v477_v10, %v478_v11  ;;  %v2426_v29 = vpack.c.bf16 %v271_v12, %v271_v12  ;;  %v426_v31 = vrot.slane %v2410_v15, 1  ;;  %1140 = vmatprep.subr.bf16.mxu0 %v2221_v1  ;;  %2086 = vmatprep.subr.bf16.mxu1 %v2221_v1  ;;  %v2154_v11 = vld [vmem:[%s4254_s1 + $0x40] sm:$0xff]  }
  0x2b   : > { %v2432_v32 = vpack.c.bf16 %v285_v19, %v284_v17  ;;  %v336_v33 = vpack.c.bf16 %v286_v20, %v286_v20  ;;  %v427_v34 = vrot.slane %v2418_v21, 1  ;;  %v402_v36 = vrot.slane %v2412_v16, 1 }
  0x2c   : > { %609 = vrot.lane.b32.xlu1 %v2397_v3, %s2225_s28  ;;  %593 = vrot.lane.b32.xlu0 %v2404_v9, %s2225_s28  ;;  %v2440_v37 = vpack.c.bf16 %v261_v23, %v260_v22  ;;  %v320_v38 = vpack.c.bf16 %v262_v26, %v262_v26  ;;  %v403_v39 = vrot.slane %v2426_v29, 1  ;;  %v290_v59 = vmax.f32 %v230_v43, 0.0  ;;  %v236_v22 = vld [vmem:[%s2322_s11 + $0x138] sm:$0xff]  ;;  %v237_v23 = vld [vmem:[%s2322_s11 + $0x140] sm:$0xff] }
  0x2d   : > { %v417_v41 = vrot.slane %v2432_v32, 1  ;;  %v418_v42 = vrot.slane %v336_v33, 1  ;;  %v2459_v49 = vsel %vm389_vm1, %v426_v31, %v427_v34  ;;  %v498_v56 = vrot.slane %v2432_v32, 2  ;;  %1141 = vmatpush1.bf16.msra.mxu0 %v2153_v53  ;;  %2095 = vmatpush1.bf16.msra.mxu1 %v2153_v53  ;;  %v212_v26 = vld [vmem:[%s2322_s11 + $0x78] sm:$0xff] }
  0x2e   : > { %v393_v45 = vrot.slane %v2440_v37, 1  ;;  %v394_v46 = vrot.slane %v320_v38, 1  ;;  %v2462_v50 = vsel %vm389_vm1, %v402_v36, %v403_v39  ;;  %v499_v57 = vrot.slane %v336_v33, 2  ;;  %1142 = vmatprep.subr.bf16.mxu0 %v2221_v1  ;;  %2087 = vmatprep.subr.bf16.mxu1 %v2221_v1  ;;  %v238_v36 = vld [vmem:[%s2322_s11 + $0x148] sm:$0xf] }
  0x2f   : > { %v474_v58 = vrot.slane %v2440_v37, 2  ;;  %v2473_v60 = vsel %vm389_vm1, %v417_v41, %v418_v42  ;;  %v475_v61 = vrot.slane %v320_v38, 2  ;;  %v291_v62 = vmax.f32 %v231_v44, 0.0  ;;  %v214_v38 = vld [vmem:[%s2322_s11 + $0x88] sm:$0xf] }
  0x30   : > { %647 = vrot.lane.b32.xlu1 %v2421_v27, %s2226_s5  ;;  %631 = vrot.lane.b32.xlu0 %v2424_v28, %s2226_s5  ;;  %v266_v63 = vmax.f32 %v206_v47, 0.0  ;;  %v395_v0 = vsel %vm389_vm1, %v393_v45, %v394_v46  ;;  %v267_v2 = vmax.f32 %v207_v48, 0.0  ;;  %v292_v4 = vmax.f32 %v232_v51, 0.0 }
  0x31   : > { %v268_v5 = vmax.f32 %v208_v52, 0.0  ;;  %v507_v6 = vrot.slane %v2410_v15, 2  ;;  %v508_v7 = vrot.slane %v2418_v21, 2  ;;  %v483_v8 = vrot.slane %v2412_v16, 2  ;;  %1143 = vmatpush1.bf16.msra.mxu0 %v2154_v11  ;;  %2096 = vmatpush1.bf16.msra.mxu1 %v2154_v11  ;;  %v241_v11 = vld [vmem:[%s2322_s11 + $0x160] sm:$0xf] }
  0x32   : > { %v484_v10 = vrot.slane %v2426_v29, 2  ;;  %v2491_v12 = vsel %vm470_vm0, %v498_v56, %v499_v57  ;;  %v476_v13 = vsel %vm470_vm0, %v474_v58, %v475_v61  ;;  %v2497_v14 = vpack.c.bf16 %v291_v62, %v290_v59  ;;  %v213_v29 = vld [vmem:[%s2322_s11 + $0x80] sm:$0xff] }
  0x33   : > { %v2499_v17 = vpack.c.bf16 %v267_v2, %v266_v63  ;;  %v340_v19 = vpack.c.bf16 %v292_v4, %v292_v4  ;;  %v324_v1 = vpack.c.bf16 %v268_v5, %v268_v5  ;;  %v2502_v20 = vsel %vm470_vm0, %v507_v6, %v508_v7  ;;  %v239_v6 = vld [vmem:[%s2322_s11 + $0x150] sm:$0xff]  ;;  %v240_v7 = vld [vmem:[%s2322_s11 + $0x158] sm:$0xff] }
  0x34   : > { %681 = vrot.lane.b32.xlu1 %v2410_v15, %s2227_s8  ;;  %665 = vrot.lane.b32.xlu0 %v2412_v16, %s2227_s8  ;;  %v2505_v21 = vsel %vm470_vm0, %v483_v8, %v484_v10  ;;  %v423_v30 = vrot.slane %v2497_v14, 1  ;;  %v296_v39 = vmax.f32 %v236_v22, 0.0  ;;  %v297_v40 = vmax.f32 %v237_v23, 0.0  ;;  %v215_v8 = vld [vmem:[%s2322_s11 + $0x90] sm:$0xff]  ;;  %v216_v10 = vld [vmem:[%s2322_s11 + $0x98] sm:$0xff] }
  0x35   : > { %2055 = vmatprep.mubr.msk.bf16.mxu0 %vm743_vm2, %v2505_v21  ;;  %2063 = vmatprep.mubr.msk.bf16.mxu1 %vm743_vm2, %v2502_v20  ;;  %v424_v31 = vrot.slane %v340_v19, 1  ;;  %v399_v33 = vrot.slane %v2499_v17, 1  ;;  %v400_v34 = vrot.slane %v324_v1, 1  ;;  %v272_v41 = vmax.f32 %v212_v26, 0.0 }
  0x36   : > { %v273_v42 = vmax.f32 %v213_v29, 0.0  ;;  %v504_v43 = vrot.slane %v2497_v14, 2  ;;  %v505_v44 = vrot.slane %v340_v19, 2  ;;  %v480_v45 = vrot.slane %v2499_v17, 2 }
  0x37   : > { %v298_v46 = vmax.f32 %v238_v36, 0.0  ;;  %v2529_v47 = vsel %vm389_vm1, %v423_v30, %v424_v31  ;;  %v401_v48 = vsel %vm389_vm1, %v399_v33, %v400_v34  ;;  %v481_v51 = vrot.slane %v324_v1, 2 }
  0x38   : > { %721 = vrot.lane.b32.xlu1 %v2459_v49, %s2228_s12  ;;  %705 = vrot.lane.b32.xlu0 %v2462_v50, %s2228_s12  ;;  %v274_v52 = vmax.f32 %v214_v38, 0.0  ;;  %v2535_v53 = vpack.c.bf16 %v297_v40, %v296_v39  ;;  %v2537_v56 = vpack.c.bf16 %v273_v42, %v272_v41  ;;  %v2540_v57 = vsel %vm470_vm0, %v504_v43, %v505_v44  ;;  %v242_v41 = vld [vmem:[%s2322_s11 + $0x168] sm:$0xff]  ;;  %v243_v42 = vld [vmem:[%s2322_s11 + $0x170] sm:$0xff] }
  0x39   : > { %v482_v58 = vsel %vm470_vm0, %v480_v45, %v481_v51  ;;  %v2543_v59 = vpack.c.bf16 %v298_v46, %v298_v46  ;;  %v299_v19 = vmax.f32 %v239_v6, 0.0  ;;  %v275_v1 = vmax.f32 %v215_v8, 0.0  ;;  %v218_v43 = vld [vmem:[%s2322_s11 + $0xa8] sm:$0xff]  ;;  %v219_v44 = vld [vmem:[%s2322_s11 + $0xb0] sm:$0xff]  ;;  %v244_v45 = vld [vmem:[%s2322_s11 + $0x178] sm:$0xf] }
  0x3a   : > { %v2545_v61 = vpack.c.bf16 %v274_v52, %v274_v52  ;;  %v429_v62 = vrot.slane %v2535_v53, 1  ;;  %v276_v22 = vmax.f32 %v216_v10, 0.0  ;;  %v301_v23 = vmax.f32 %v241_v11, 0.0  ;;  %v220_v46 = vld [vmem:[%s2322_s11 + $0xb8] sm:$0xf] }
  0x3b   : > { %v430_v63 = vrot.slane %v2543_v59, 1  ;;  %v510_v51 = vrot.slane %v2535_v53, 2  ;;  %v511_v52 = vrot.slane %v2543_v59, 2  ;;  %v304_v6 = vmax.f32 %v244_v45, 0.0 }
  0x3c   : > { %456 = vrot.lane.b32.xlu1 %v2473_v60, %s2224_s27  ;;  %440 = vrot.lane.b32.xlu0 %v395_v0, %s2224_s27  ;;  %v405_v0 = vrot.slane %v2537_v56, 1  ;;  %v406_v2 = vrot.slane %v2545_v61, 1  ;;  %v2592_v29 = vpack.c.bf16 %v276_v22, %v275_v1  ;;  %v2594_v30 = vpack.c.bf16 %v301_v23, %v301_v23 }
  0x3d   : > { %v2559_v4 = vsel %vm389_vm1, %v429_v62, %v430_v63  ;;  %v302_v62 = vmax.f32 %v242_v41, 0.0  ;;  %v303_v63 = vmax.f32 %v243_v42, 0.0  ;;  %v2645_v59 = vsel %vm470_vm0, %v510_v51, %v511_v52  ;;  %v245_v41 = vld [vmem:[%s2322_s11 + $0x180] sm:$0xff]  ;;  %v246_v42 = vld [vmem:[%s2322_s11 + $0x188] sm:$0xff] }
  0x3e   : > { %v2562_v5 = vsel %vm389_vm1, %v405_v0, %v406_v2  ;;  %v433_v34 = vrot.slane %v2594_v30, 1  ;;  %v408_v36 = vrot.slane %v2592_v29, 1  ;;  %v278_v0 = vmax.f32 %v218_v43, 0.0  ;;  %v247_v43 = vld [vmem:[%s2322_s11 + $0x190] sm:$0xf] }
  0x3f   : > { %v279_v2 = vmax.f32 %v219_v44, 0.0  ;;  %v2650_v10 = vpack.c.bf16 %v303_v63, %v302_v62  ;;  %v2654_v11 = vpack.c.bf16 %v304_v6, %v304_v6  ;;  %v306_v45 = vmax.f32 %v246_v42, 0.0 }
  0x40   : > { %537 = vrot.lane.b32.xlu1 %v2491_v12, %s2223_s23  ;;  %521 = vrot.lane.b32.xlu0 %v476_v13, %s2223_s23  ;;  %v217_v13 = vld [vmem:[%s2322_s11 + $0xa0] sm:$0xf] }
  0x41   : > { %v277_v26 = vmax.f32 %v217_v13, 0.0 }
  0x43   : > { %v2596_v31 = vpack.c.bf16 %v277_v26, %v277_v26 }
  0x44   : > { %571 = vrot.lane.b32.xlu1 %v2497_v14, %s2222_s14  ;;  %555 = vrot.lane.b32.xlu0 %v2499_v17, %s2222_s14 }
  0x45   : > { %v409_v38 = vrot.slane %v2596_v31, 1  ;;  %v490_v44 = vrot.slane %v2596_v31, 2 }
  0x47   : > { %v2614_v40 = vsel %vm389_vm1, %v408_v36, %v409_v38 }
  0x48   : > { %611 = vrot.lane.b32.xlu1 %v2529_v47, %s2225_s28  ;;  %595 = vrot.lane.b32.xlu0 %v401_v48, %s2225_s28 }
  0x4c   : > { %649 = vrot.lane.b32.xlu1 %v2540_v57, %s2226_s5  ;;  %633 = vrot.lane.b32.xlu0 %v482_v58, %s2226_s5 }
  0x50   : > { %683 = vrot.lane.b32.xlu1 %v2535_v53, %s2227_s8  ;;  %667 = vrot.lane.b32.xlu0 %v2537_v56, %s2227_s8 }
  0x54   : > { %723 = vrot.lane.b32.xlu1 %v2559_v4, %s2228_s12  ;;  %707 = vrot.lane.b32.xlu0 %v2562_v5, %s2228_s12 }
  0x58   : > { %458 = vrot.lane.b32.xlu1 %v2397_v3, %s2224_s27  ;;  %442 = vrot.lane.b32.xlu0 %v2404_v9, %s2224_s27  ;;  %v300_v9 = vmax.f32 %v240_v7, 0.0  ;;  %v280_v7 = vmax.f32 %v220_v46, 0.0  ;;  %v307_v46 = vmax.f32 %v247_v43, 0.0 }
  0x5a   : > { %v2656_v13 = vpack.c.bf16 %v280_v7, %v280_v7  ;;  %v2711_v31 = vpack.c.bf16 %v307_v46, %v307_v46 }
  0x5c   : > { %539 = vrot.lane.b32.xlu1 %v2421_v27, %s2223_s23  ;;  %523 = vrot.lane.b32.xlu0 %v2424_v28, %s2223_s23  ;;  %v2590_v28 = vpack.c.bf16 %v300_v9, %v299_v19  ;;  %v435_v19 = vrot.slane %v2650_v10, 1  ;;  %v436_v9 = vrot.slane %v2654_v11, 1  ;;  %v412_v22 = vrot.slane %v2656_v13, 1 }
  0x5d   : > { %v588_v7 = vrot.slane %v2711_v31, 1 }
  0x5e   : > { %v432_v33 = vrot.slane %v2590_v28, 1  ;;  %v2671_v23 = vsel %vm389_vm1, %v435_v19, %v436_v9 }
  0x60   : > { %573 = vrot.lane.b32.xlu1 %v2410_v15, %s2222_s14  ;;  %557 = vrot.lane.b32.xlu0 %v2412_v16, %s2222_s14  ;;  %v2611_v39 = vsel %vm389_vm1, %v432_v33, %v433_v34 }
  0x64   : > { %613 = vrot.lane.b32.xlu1 %v2459_v49, %s2225_s28  ;;  %597 = vrot.lane.b32.xlu0 %v2462_v50, %s2225_s28 }
  0x68   : > { %651 = vrot.lane.b32.xlu1 %v2502_v20, %s2226_s5  ;;  %635 = vrot.lane.b32.xlu0 %v2505_v21, %s2226_s5 }
  0x6c   : > { %685 = vrot.lane.b32.xlu1 %v2590_v28, %s2227_s8  ;;  %669 = vrot.lane.b32.xlu0 %v2592_v29, %s2227_s8 }
  0x70   : > { %725 = vrot.lane.b32.xlu1 %v2611_v39, %s2228_s12  ;;  %709 = vrot.lane.b32.xlu0 %v2614_v40, %s2228_s12 }
  0x74   : > { %460 = vrot.lane.b32.xlu1 %v2529_v47, %s2224_s27  ;;  %444 = vrot.lane.b32.xlu0 %v401_v48, %s2224_s27  ;;  %v486_v48 = vrot.slane %v2537_v56, 2 }
  0x78   : > { %541 = vrot.lane.b32.xlu1 %v2540_v57, %s2223_s23  ;;  %525 = vrot.lane.b32.xlu0 %v482_v58, %s2223_s23  ;;  %v487_v58 = vrot.slane %v2545_v61, 2  ;;  %v2652_v61 = vpack.c.bf16 %v279_v2, %v278_v0 }
  0x7a   : > { %v2648_v8 = vsel %vm470_vm0, %v486_v48, %v487_v58  ;;  %v411_v1 = vrot.slane %v2652_v61, 1 }
  0x7c   : > { %575 = vrot.lane.b32.xlu1 %v2535_v53, %s2222_s14  ;;  %559 = vrot.lane.b32.xlu0 %v2537_v56, %s2222_s14  ;;  %v2674_v26 = vsel %vm389_vm1, %v411_v1, %v412_v22 }
  0x80   : > { %615 = vrot.lane.b32.xlu1 %v2559_v4, %s2225_s28  ;;  %599 = vrot.lane.b32.xlu0 %v2562_v5, %s2225_s28 }
  0x84   : > { %653 = vrot.lane.b32.xlu1 %v2645_v59, %s2226_s5  ;;  %637 = vrot.lane.b32.xlu0 %v2648_v8, %s2226_s5 }
  0x88   : > { %687 = vrot.lane.b32.xlu1 %v2650_v10, %s2227_s8  ;;  %671 = vrot.lane.b32.xlu0 %v2652_v61, %s2227_s8 }
  0x8c   : > { %727 = vrot.lane.b32.xlu1 %v2671_v23, %s2228_s12  ;;  %711 = vrot.lane.b32.xlu0 %v2674_v26, %s2228_s12 }
  0x90   : > { %462 = vrot.lane.b32.xlu1 %v2459_v49, %s2224_s27  ;;  %446 = vrot.lane.b32.xlu0 %v2462_v50, %s2224_s27  ;;  %v513_v49 = vrot.slane %v2590_v28, 2  ;;  %v514_v50 = vrot.slane %v2594_v30, 2 }
  0x91   : > { %v570_v33 = vpop.permute.xlu1 %569 }
  0x92   : > { %v554_v34 = vpop.permute.xlu0 %553  ;;  %v2704_v48 = vsel %vm470_vm0, %v513_v49, %v514_v50 }
  0x94   : > { %543 = vrot.lane.b32.xlu1 %v2502_v20, %s2223_s23  ;;  %527 = vrot.lane.b32.xlu0 %v2505_v21, %s2223_s23  ;;  %v489_v20 = vrot.slane %v2592_v29, 2  ;;  %v305_v21 = vmax.f32 %v245_v41, 0.0 }
  0x96   : > { %v520_v36 = vpop.permute.xlu1 %519  ;;  %v439_v38 = vpop.permute.xlu0 %438  ;;  %v2707_v30 = vsel %vm470_vm0, %v489_v20, %v490_v44  ;;  %v2709_v58 = vpack.c.bf16 %v306_v45, %v305_v21 }
  0x97   : > { %v746_v2 = vsel %vm743_vm2, %v2343_v25, %v439_v38 }
  0x98   : > { %577 = vrot.lane.b32.xlu1 %v2590_v28, %s2222_s14  ;;  %561 = vrot.lane.b32.xlu0 %v2592_v29, %s2222_s14  ;;  %v587_v6 = vrot.slane %v2709_v58, 1  ;;  %v794_v22 = vsel %vm792_vm3, %v746_v2, %v520_v36  ;;  %v516_v2 = vrot.slane %v2650_v10, 2 }
  0x99   : > { %v827_v43 = vsel %vm825_vm4, %v794_v22, %v554_v34 }
  0x9a   : > { %v536_v51 = vpop.permute.xlu1 %535  ;;  %v455_v52 = vpop.permute.xlu0 %454  ;;  %v2731_v38 = vsel %vm389_vm1, %v587_v6, %v588_v7  ;;  %v517_v6 = vrot.slane %v2654_v11, 2  ;;  %v493_v7 = vrot.slane %v2656_v13, 2 }
  0x9b   : > { %v770_v0 = vsel %vm743_vm2, %v2355_v35, %v455_v52 }
  0x9c   : > { %617 = vrot.lane.b32.xlu1 %v2611_v39, %s2225_s28  ;;  %601 = vrot.lane.b32.xlu0 %v2614_v40, %s2225_s28  ;;  %v810_v19 = vsel %vm792_vm3, %v770_v0, %v536_v51  ;;  %v250_v0 = vld [vmem:[%s2322_s11 + $0x1a8] sm:$0xf] }
  0x9d   : > { %v843_v25 = vsel %vm825_vm4, %v810_v19, %v570_v33 }
  0x9e   : > { %v610_v62 = vpop.permute.xlu1 %609  ;;  %v594_v63 = vpop.permute.xlu0 %593 }
  0x9f   : > { %v876_v36 = vsel %vm858_vm5, %v843_v25, %v610_v62  ;;  %v860_v49 = vsel %vm858_vm5, %v827_v43, %v594_v63  ;;  %v248_v63 = vld [vmem:[%s2322_s11 + $0x198] sm:$0xff]  ;;  %v2774_v25 = vsel %vm470_vm0, %v516_v2, %v517_v6 }
  0xa0   : > { %655 = vrot.lane.b32.xlu1 %v2704_v48, %s2226_s5  ;;  %639 = vrot.lane.b32.xlu0 %v2707_v30, %s2226_s5 }
  0xa2   : > { %v648_v9 = vpop.permute.xlu1 %647  ;;  %v632_v1 = vpop.permute.xlu0 %631 }
  0xa3   : > { %v909_v33 = vsel %vm891_vm6, %v876_v36, %v648_v9  ;;  %v893_v50 = vsel %vm891_vm6, %v860_v49, %v632_v1  ;;  %v310_v9 = vmax.f32 %v250_v0, 0.0 }
  0xa4   : > { %689 = vrot.lane.b32.xlu1 %v2709_v58, %s2227_s8  ;;  %673 = vrot.lane.b32.xlu0 %v2355_v35, %s2227_s8 }
  0xa5   : > { %v2781_v13 = vpack.c.bf16 %v310_v9, %v310_v9 }
  0xa6   : > { %v682_v41 = vpop.permute.xlu1 %681  ;;  %v666_v42 = vpop.permute.xlu0 %665 }
  0xa7   : > { %v942_v20 = vsel %vm924_vm7, %v909_v33, %v682_v41  ;;  %v926_v34 = vsel %vm924_vm7, %v893_v50, %v666_v42  ;;  %v591_v49 = vrot.slane %v2781_v13, 1 }
  0xa8   : > { %729 = vrot.lane.b32.xlu1 %v2731_v38, %s2228_s12  ;;  %713 = vrot.lane.b32.xlu0 %v2382_v55, %s2228_s12 }
  0xaa   : > { %v722_v44 = vpop.permute.xlu1 %721  ;;  %v706_v21 = vpop.permute.xlu0 %705 }
  0xab   : > { %v959_v45 = vsel %vm957_vm8, %v926_v34, %v706_v21  ;;  %v983_v46 = vsel %vm957_vm8, %v942_v20, %v722_v44 }
  0xac   : > { %464 = vrot.lane.b32.xlu1 %v2559_v4, %s2224_s27  ;;  %448 = vrot.lane.b32.xlu0 %v2562_v5, %s2224_s27  ;;  %v249_v5 = vld [vmem:[%s2322_s11 + $0x1a0] sm:$0xff] }
  0xad   : > { %1159 = vmatmul.mubr.bf16.vlgmr.msra.gmra.mrb[0].mxu0 %v959_v45  ;;  %1223 = vmatmul.mubr.bf16.vlgmr.msra.gmra.mrb[0].mxu1 %v983_v46  ;;  %v309_v19 = vmax.f32 %v249_v5, 0.0 }
  0xae   : > { %v457_v51 = vpop.permute.xlu1 %456  ;;  %v441_v52 = vpop.permute.xlu0 %440  ;;  %2056 = vmatprep.mubr.msk.bf16.mxu0 %vm743_vm2, %v2648_v8  ;;  %2064 = vmatprep.mubr.msk.bf16.mxu1 %vm743_vm2, %v2645_v59 }
  0xaf   : > { %v773_v20 = vsel %vm743_vm2, %v2432_v32, %v457_v51  ;;  %v749_v34 = vsel %vm743_vm2, %v2440_v37, %v441_v52 }
  0xb0   : > { %545 = vrot.lane.b32.xlu1 %v2645_v59, %s2223_s23  ;;  %529 = vrot.lane.b32.xlu0 %v2648_v8, %s2223_s23  ;;  %v492_v59 = vrot.slane %v2652_v61, 2  ;;  %v308_v8 = vmax.f32 %v248_v63, 0.0 }
  0xb2   : > { %v538_v4 = vpop.permute.xlu1 %537  ;;  %v522_v62 = vpop.permute.xlu0 %521  ;;  %v2777_v11 = vsel %vm470_vm0, %v492_v59, %v493_v7  ;;  %v2779_v41 = vpack.c.bf16 %v309_v19, %v308_v8 }
  0xb3   : > { %v812_v21 = vsel %vm792_vm3, %v773_v20, %v538_v4  ;;  %v796_v45 = vsel %vm792_vm3, %v749_v34, %v522_v62 }
  0xb4   : > { %579 = vrot.lane.b32.xlu1 %v2650_v10, %s2222_s14  ;;  %563 = vrot.lane.b32.xlu0 %v2652_v61, %s2222_s14  ;;  %v590_v36 = vrot.slane %v2779_v41, 1 }
  0xb6   : > { %v572_v1 = vpop.permute.xlu1 %571  ;;  %v556_v22 = vpop.permute.xlu0 %555  ;;  %v2798_v44 = vsel %vm389_vm1, %v590_v36, %v591_v49  ;;  %v626_v36 = vrot.slane %v2711_v31, 2 }
  0xb7   : > { %v845_v5 = vsel %vm825_vm4, %v812_v21, %v572_v1  ;;  %v829_v0 = vsel %vm825_vm4, %v796_v45, %v556_v22  ;;  %v251_v22 = vld [vmem:[%s2322_s11 + $0x1b0] sm:$0xff] }
  0xb8   : > { %619 = vrot.lane.b32.xlu1 %v2671_v23, %s2225_s28  ;;  %603 = vrot.lane.b32.xlu0 %v2674_v26, %s2225_s28  ;;  %v311_v49 = vmax.f32 %v251_v22, 0.0 }
  0xba   : > { %v612_v42 = vpop.permute.xlu1 %611  ;;  %v596_v43 = vpop.permute.xlu0 %595 }
  0xbb   : > { %v878_v2 = vsel %vm858_vm5, %v845_v5, %v612_v42  ;;  %v862_v51 = vsel %vm858_vm5, %v829_v0, %v596_v43  ;;  %v253_v42 = vld [vmem:[%s2322_s11 + $0x1c0] sm:$0xf]  ;;  %v625_v43 = vrot.slane %v2709_v58, 2 }
  0xbc   : > { %657 = vrot.lane.b32.xlu1 %v2774_v25, %s2226_s5  ;;  %641 = vrot.lane.b32.xlu0 %v2777_v11, %s2226_s5 }
  0xbd   : > { %v2842_v20 = vsel %vm470_vm0, %v625_v43, %v626_v36  ;;  %v628_v43 = vrot.slane %v2779_v41, 2  ;;  %v629_v36 = vrot.slane %v2781_v13, 2 }
  0xbe   : > { %v650_v33 = vpop.permute.xlu1 %649  ;;  %v634_v50 = vpop.permute.xlu0 %633 }
  0xbf   : > { %v911_v37 = vsel %vm891_vm6, %v878_v2, %v650_v33  ;;  %v895_v52 = vsel %vm891_vm6, %v862_v51, %v634_v50  ;;  %v313_v33 = vmax.f32 %v253_v42, 0.0  ;;  %v256_v42 = vld [vmem:[%s2322_s11 + $0x1d8] sm:$0xf] }
  0xc0   : > { %691 = vrot.lane.b32.xlu1 %v2779_v41, %s2227_s8  ;;  %675 = vrot.lane.b32.xlu0 %v2432_v32, %s2227_s8 }
  0xc2   : > { %v684_v46 = vpop.permute.xlu1 %683  ;;  %v668_v63 = vpop.permute.xlu0 %667 }
  0xc3   : > { %v944_v4 = vsel %vm924_vm7, %v911_v37, %v684_v46  ;;  %v928_v62 = vsel %vm924_vm7, %v895_v52, %v668_v63 }
  0xc4   : > { %731 = vrot.lane.b32.xlu1 %v2798_v44, %s2228_s12  ;;  %715 = vrot.lane.b32.xlu0 %v2473_v60, %s2228_s12 }
  0xc6   : > { %v724_v6 = vpop.permute.xlu1 %723  ;;  %v708_v59 = vpop.permute.xlu0 %707 }
  0xc7   : > { %v962_v7 = vsel %vm957_vm8, %v928_v62, %v708_v59  ;;  %v986_v8 = vsel %vm957_vm8, %v944_v4, %v724_v6 }
  0xc8   : > { %466 = vrot.lane.b32.xlu1 %v2611_v39, %s2224_s27  ;;  %450 = vrot.lane.b32.xlu0 %v2614_v40, %s2224_s27  ;;  %v252_v40 = vld [vmem:[%s2322_s11 + $0x1b8] sm:$0xff] }
  0xc9   : > { %1167 = vmatmul.mubr.bf16.gmra.mrb[4].mxu0 %v962_v7  ;;  %1231 = vmatmul.mubr.bf16.gmra.mrb[4].mxu1 %v986_v8 }
  0xca   : > { %v459_v19 = vpop.permute.xlu1 %458  ;;  %v443_v9 = vpop.permute.xlu0 %442  ;;  %2057 = vmatprep.mubr.msk.bf16.mxu0 %vm743_vm2, %v2707_v30  ;;  %2065 = vmatprep.mubr.msk.bf16.mxu1 %vm743_vm2, %v2704_v48 }
  0xcb   : > { %v776_v46 = vsel %vm743_vm2, %v2334_v18, %v459_v19  ;;  %v752_v63 = vsel %vm743_vm2, %v2341_v24, %v443_v9 }
  0xcc   : > { %547 = vrot.lane.b32.xlu1 %v2704_v48, %s2223_s23  ;;  %531 = vrot.lane.b32.xlu0 %v2707_v30, %s2223_s23  ;;  %v312_v48 = vmax.f32 %v252_v40, 0.0  ;;  %v254_v40 = vld [vmem:[%s2322_s11 + $0x1c8] sm:$0xff] }
  0xce   : > { %v540_v39 = vpop.permute.xlu1 %539  ;;  %v524_v1 = vpop.permute.xlu0 %523  ;;  %v2844_v34 = vpack.c.bf16 %v312_v48, %v311_v49  ;;  %v314_v49 = vmax.f32 %v254_v40, 0.0  ;;  %v316_v48 = vmax.f32 %v256_v42, 0.0 }
  0xcf   : > { %v814_v0 = vsel %vm792_vm3, %v776_v46, %v540_v39  ;;  %v798_v2 = vsel %vm792_vm3, %v752_v63, %v524_v1 }
  0xd0   : > { %581 = vrot.lane.b32.xlu1 %v2709_v58, %s2222_s14  ;;  %565 = vrot.lane.b32.xlu0 %v2355_v35, %s2222_s14  ;;  %v2846_v35 = vpack.c.bf16 %v313_v33, %v313_v33 }
  0xd2   : > { %v574_v50 = vpop.permute.xlu1 %573  ;;  %v558_v30 = vpop.permute.xlu0 %557  ;;  %v700_v21 = vrot.slane %v2846_v35, 1 }
  0xd3   : > { %v847_v52 = vsel %vm825_vm4, %v814_v0, %v574_v50  ;;  %v831_v4 = vsel %vm825_vm4, %v798_v2, %v558_v30  ;;  %v2904_v50 = vsel %vm470_vm0, %v628_v43, %v629_v36 }
  0xd4   : > { %621 = vrot.lane.b32.xlu1 %v2731_v38, %s2225_s28  ;;  %605 = vrot.lane.b32.xlu0 %v2382_v55, %s2225_s28  ;;  %v699_v38 = vrot.slane %v2844_v34, 1 }
  0xd6   : > { %v614_v58 = vpop.permute.xlu1 %613  ;;  %v598_v31 = vpop.permute.xlu0 %597  ;;  %v701_v5 = vsel %vm389_vm1, %v699_v38, %v700_v21 }
  0xd7   : > { %v880_v62 = vsel %vm858_vm5, %v847_v52, %v614_v58  ;;  %v864_v6 = vsel %vm858_vm5, %v831_v4, %v598_v31 }
  0xd8   : > { %659 = vrot.lane.b32.xlu1 %v2842_v20, %s2226_s5  ;;  %643 = vrot.lane.b32.xlu0 %v2379_v54, %s2226_s5 }
  0xda   : > { %v652_v55 = vpop.permute.xlu1 %651  ;;  %v636_v45 = vpop.permute.xlu0 %635 }
  0xdb   : > { %v897_v24 = vsel %vm891_vm6, %v864_v6, %v636_v45 }
  0xdc   : > { %693 = vrot.lane.b32.xlu1 %v2844_v34, %s2227_s8  ;;  %677 = vrot.lane.b32.xlu0 %v2334_v18, %s2227_s8  ;;  %v913_v18 = vsel %vm891_vm6, %v880_v62, %v652_v55 }
  0xde   : > { %v686_v51 = vpop.permute.xlu1 %685  ;;  %v670_v37 = vpop.permute.xlu0 %669 }
  0xdf   : > { %v946_v59 = vsel %vm924_vm7, %v913_v18, %v686_v51  ;;  %v930_v7 = vsel %vm924_vm7, %v897_v24, %v670_v37 }
  0xe0   : > { %733 = vrot.lane.b32.xlu1 %v701_v5, %s2228_s12  ;;  %717 = vrot.lane.b32.xlu0 %v2397_v3, %s2228_s12 }
  0xe2   : > { %v726_v8 = vpop.permute.xlu1 %725  ;;  %v710_v19 = vpop.permute.xlu0 %709 }
  0xe3   : > { %v965_v9 = vsel %vm957_vm8, %v930_v7, %v710_v19  ;;  %v989_v39 = vsel %vm957_vm8, %v946_v59, %v726_v8 }
  0xe4   : > { %468 = vrot.lane.b32.xlu1 %v2671_v23, %s2224_s27  ;;  %452 = vrot.lane.b32.xlu0 %v2674_v26, %s2224_s27  ;;  %v255_v26 = vld [vmem:[%s2322_s11 + $0x1d0] sm:$0xff] }
  0xe5   : > { %1175 = vmatmul.mubr.bf16.gmra.mrb[8].mxu0 %v965_v9  ;;  %1239 = vmatmul.mubr.bf16.gmra.mrb[8].mxu1 %v989_v39 }
  0xe6   : > { %v461_v3 = vpop.permute.xlu1 %460  ;;  %v445_v1 = vpop.permute.xlu0 %444  ;;  %2058 = vmatprep.mubr.msk.bf16.mxu0 %vm743_vm2, %v2777_v11  ;;  %2066 = vmatprep.mubr.msk.bf16.mxu1 %vm743_vm2, %v2774_v25 }
  0xe7   : > { %v779_v38 = vsel %vm743_vm2, %v2497_v14, %v461_v3  ;;  %v755_v21 = vsel %vm743_vm2, %v2499_v17, %v445_v1 }
  0xe8   : > { %549 = vrot.lane.b32.xlu1 %v2774_v25, %s2223_s23  ;;  %533 = vrot.lane.b32.xlu0 %v2777_v11, %s2223_s23  ;;  %v315_v25 = vmax.f32 %v255_v26, 0.0 }
  0xea   : > { %v542_v23 = vpop.permute.xlu1 %541  ;;  %v526_v22 = vpop.permute.xlu0 %525  ;;  %v2906_v30 = vpack.c.bf16 %v315_v25, %v314_v49 }
  0xeb   : > { %v816_v45 = vsel %vm792_vm3, %v779_v38, %v542_v23  ;;  %v800_v46 = vsel %vm792_vm3, %v755_v21, %v526_v22 }
  0xec   : > { %583 = vrot.lane.b32.xlu1 %v2779_v41, %s2222_s14  ;;  %567 = vrot.lane.b32.xlu0 %v2432_v32, %s2222_s14  ;;  %v2908_v32 = vpack.c.bf16 %v316_v48, %v316_v48  ;;  %s2229_s14 = smov [#allocation2]  }
  0xed   : > { %s2161_s22 = sshll.u32 %s2229_s14, 4  ;;  %s2162_s22 = int_to_ptr.vmem [resolvable:$false] %s2161_s22 }
  0xee   : > { %v576_v33 = vpop.permute.xlu1 %575  ;;  %v560_v11 = vpop.permute.xlu0 %559  ;;  %v703_v58 = vrot.slane %v2908_v32, 1  ;;  %s2163_s27 = scalar_lea.vmem %s2162_s22, 2048 }
  0xef   : > { %v849_v0 = vsel %vm825_vm4, %v816_v45, %v576_v33  ;;  %v833_v2 = vsel %vm825_vm4, %v800_v46, %v560_v11 }
  0xf0   : > { %623 = vrot.lane.b32.xlu1 %v2798_v44, %s2225_s28  ;;  %607 = vrot.lane.b32.xlu0 %v2473_v60, %s2225_s28  ;;  %v702_v44 = vrot.slane %v2906_v30, 1 }
  0xf2   : > { %v616_v41 = vpop.permute.xlu1 %615  ;;  %v600_v13 = vpop.permute.xlu0 %599  ;;  %v704_v55 = vsel %vm389_vm1, %v702_v44, %v703_v58 }
  0xf3   : > { %v882_v51 = vsel %vm858_vm5, %v849_v0, %v616_v41  ;;  %v866_v37 = vsel %vm858_vm5, %v833_v2, %v600_v13 }
  0xf4   : > { %661 = vrot.lane.b32.xlu1 %v2904_v50, %s2226_s5  ;;  %645 = vrot.lane.b32.xlu0 %v2491_v12, %s2226_s5 }
  0xf6   : > { %v654_v60 = vpop.permute.xlu1 %653  ;;  %v638_v31 = vpop.permute.xlu0 %637 }
  0xf7   : > { %v899_v17 = vsel %vm891_vm6, %v866_v37, %v638_v31 }
  0xf8   : > { %695 = vrot.lane.b32.xlu1 %v2906_v30, %s2227_s8  ;;  %679 = vrot.lane.b32.xlu0 %v2497_v14, %s2227_s8  ;;  %v915_v14 = vsel %vm891_vm6, %v882_v51, %v654_v60 }
  0xfa   : > { %v688_v63 = vpop.permute.xlu1 %687  ;;  %v672_v5 = vpop.permute.xlu0 %671 }
  0xfb   : > { %v948_v52 = vsel %vm924_vm7, %v915_v14, %v688_v63  ;;  %v932_v4 = vsel %vm924_vm7, %v899_v17, %v672_v5  ;;  %v737_v14 = vrot.slane %v2844_v34, 2  ;;  %v738_v17 = vrot.slane %v2846_v35, 2 }
  0xfc   : > { %735 = vrot.lane.b32.xlu1 %v704_v55, %s2228_s12  ;;  %719 = vrot.lane.b32.xlu0 %v2529_v47, %s2228_s12 }
  0xfd   : > { %v739_v35 = vsel %vm470_vm0, %v737_v14, %v738_v17 }
  0xfe   : > { %v728_v62 = vpop.permute.xlu1 %727  ;;  %v712_v6 = vpop.permute.xlu0 %711 }
  0xff   : > { %v968_v18 = vsel %vm957_vm8, %v932_v4, %v712_v6  ;;  %v992_v24 = vsel %vm957_vm8, %v948_v52, %v728_v62 }
 0x100   : > { %1183 = vmatmul.mubr.bf16.gmra.mrb[12].mxu0 %v968_v18  ;;  %1247 = vmatmul.mubr.bf16.gmra.mrb[12].mxu1 %v992_v24 }
 0x101   : > { %2059 = vmatprep.mubr.msk.bf16.mxu0 %vm743_vm2, %v2379_v54  ;;  %2067 = vmatprep.mubr.msk.bf16.mxu1 %vm743_vm2, %v2842_v20 }
 0x102   : > { %v463_v47 = vpop.permute.xlu1 %462  ;;  %v447_v59 = vpop.permute.xlu0 %446 }
 0x103   : > { %v782_v22 = vsel %vm743_vm2, %v2410_v15, %v463_v47  ;;  %v758_v40 = vsel %vm743_vm2, %v2412_v16, %v447_v59 }
 0x106   : > { %v544_v7 = vpop.permute.xlu1 %543  ;;  %v528_v8 = vpop.permute.xlu0 %527 }
 0x107   : > { %v818_v54 = vsel %vm792_vm3, %v782_v22, %v544_v7  ;;  %v802_v20 = vsel %vm792_vm3, %v758_v40, %v528_v8 }
 0x10a   : > { %v578_v19 = vpop.permute.xlu1 %577  ;;  %v562_v9 = vpop.permute.xlu0 %561 }
 0x10b   : > { %v851_v43 = vsel %vm825_vm4, %v818_v54, %v578_v19  ;;  %v835_v36 = vsel %vm825_vm4, %v802_v20, %v562_v9 }
 0x10e   : > { %v618_v39 = vpop.permute.xlu1 %617  ;;  %v602_v3 = vpop.permute.xlu0 %601 }
 0x10f   : > { %v884_v49 = vsel %vm858_vm5, %v851_v43, %v618_v39  ;;  %v868_v25 = vsel %vm858_vm5, %v835_v36, %v602_v3 }
 0x112   : > { %v656_v1 = vpop.permute.xlu1 %655  ;;  %v640_v23 = vpop.permute.xlu0 %639 }
 0x113   : > { %v917_v48 = vsel %vm891_vm6, %v884_v49, %v656_v1  ;;  %v901_v15 = vsel %vm891_vm6, %v868_v25, %v640_v23  ;;  %v740_v49 = vrot.slane %v2906_v30, 2  ;;  %v741_v25 = vrot.slane %v2908_v32, 2 }
 0x115   : > { %v742_v32 = vsel %vm470_vm0, %v740_v49, %v741_v25 }
 0x116   : > { %v690_v26 = vpop.permute.xlu1 %689  ;;  %v674_v42 = vpop.permute.xlu0 %673 }
 0x117   : > { %v950_v16 = vsel %vm924_vm7, %v917_v48, %v690_v26  ;;  %v934_v33 = vsel %vm924_vm7, %v901_v15, %v674_v42 }
 0x11a   : > { %v730_v11 = vpop.permute.xlu1 %729  ;;  %v714_v41 = vpop.permute.xlu0 %713 }
 0x11b   : > { %v971_v13 = vsel %vm957_vm8, %v934_v33, %v714_v41  ;;  %v995_v44 = vsel %vm957_vm8, %v950_v16, %v730_v11 }
 0x11c   : > { %1191 = vmatmul.mubr.bf16.gmra.mrb[16].mxu0 %v971_v13  ;;  %1255 = vmatmul.mubr.bf16.gmra.mrb[16].mxu1 %v995_v44 }
 0x11d   : > { %2060 = vmatprep.mubr.msk.bf16.mxu0 %vm743_vm2, %v2491_v12  ;;  %2068 = vmatprep.mubr.msk.bf16.mxu1 %vm743_vm2, %v2904_v50 }
 0x11e   : > { %v465_v58 = vpop.permute.xlu1 %464  ;;  %v449_v60 = vpop.permute.xlu0 %448 }
 0x11f   : > { %v785_v0 = vsel %vm743_vm2, %v2535_v53, %v465_v58  ;;  %v761_v2 = vsel %vm743_vm2, %v2537_v56, %v449_v60 }
 0x122   : > { %v546_v31 = vpop.permute.xlu1 %545  ;;  %v530_v38 = vpop.permute.xlu0 %529 }
 0x123   : > { %v820_v12 = vsel %vm792_vm3, %v785_v0, %v546_v31  ;;  %v804_v50 = vsel %vm792_vm3, %v761_v2, %v530_v38 }
 0x126   : > { %v580_v21 = vpop.permute.xlu1 %579  ;;  %v564_v55 = vpop.permute.xlu0 %563 }
 0x127   : > { %v853_v52 = vsel %vm825_vm4, %v820_v12, %v580_v21  ;;  %v837_v4 = vsel %vm825_vm4, %v804_v50, %v564_v55 }
 0x12a   : > { %v620_v45 = vpop.permute.xlu1 %619  ;;  %v604_v46 = vpop.permute.xlu0 %603 }
 0x12b   : > { %v886_v62 = vsel %vm858_vm5, %v853_v52, %v620_v45  ;;  %v870_v53 = vsel %vm858_vm5, %v837_v4, %v604_v46 }
 0x12e   : > { %v658_v63 = vpop.permute.xlu1 %657  ;;  %v642_v5 = vpop.permute.xlu0 %641 }
 0x12f   : > { %v919_v56 = vsel %vm891_vm6, %v886_v62, %v658_v63  ;;  %v903_v6 = vsel %vm891_vm6, %v870_v53, %v642_v5 }
 0x132   : > { %v692_v51 = vpop.permute.xlu1 %691  ;;  %v676_v37 = vpop.permute.xlu0 %675 }
 0x133   : > { %v952_v18 = vsel %vm924_vm7, %v919_v56, %v692_v51  ;;  %v936_v24 = vsel %vm924_vm7, %v903_v6, %v676_v37 }
 0x136   : > { %v732_v47 = vpop.permute.xlu1 %731  ;;  %v716_v34 = vpop.permute.xlu0 %715 }
 0x137   : > { %v974_v59 = vsel %vm957_vm8, %v936_v24, %v716_v34  ;;  %v998_v7 = vsel %vm957_vm8, %v952_v18, %v732_v47 }
 0x138   : > { %1199 = vmatmul.mubr.bf16.gmra.mrb[20].mxu0 %v974_v59  ;;  %1263 = vmatmul.mubr.bf16.gmra.mrb[20].mxu1 %v998_v7 }
 0x139   : > { %2061 = vmatprep.mubr.msk.bf16.mxu0 %vm743_vm2, %v2421_v27  ;;  %2069 = vmatprep.mubr.msk.bf16.mxu1 %vm743_vm2, %v739_v35 }
 0x13a   : > { %v467_v8 = vpop.permute.xlu1 %466  ;;  %v451_v19 = vpop.permute.xlu0 %450 }
 0x13b   : > { %v788_v20 = vsel %vm743_vm2, %v2590_v28, %v467_v8  ;;  %v764_v26 = vsel %vm743_vm2, %v2592_v29, %v451_v19 }
 0x13e   : > { %v548_v9 = vpop.permute.xlu1 %547  ;;  %v532_v39 = vpop.permute.xlu0 %531 }
 0x13f   : > { %v822_v27 = vsel %vm792_vm3, %v788_v20, %v548_v9  ;;  %v806_v42 = vsel %vm792_vm3, %v764_v26, %v532_v39  ;;  %v3027_v39 = vld [vmem:[%s4255_s2] ss:$0 sm:$0xff] }
 0x142   : > { %v582_v3 = vpop.permute.xlu1 %581  ;;  %v566_v1 = vpop.permute.xlu0 %565 }
 0x143   : > { %v855_v48 = vsel %vm825_vm4, %v822_v27, %v582_v3  ;;  %v839_v15 = vsel %vm825_vm4, %v806_v42, %v566_v1 }
 0x146   : > { %v622_v23 = vpop.permute.xlu1 %621  ;;  %v606_v22 = vpop.permute.xlu0 %605 }
 0x147   : > { %v888_v16 = vsel %vm858_vm5, %v855_v48, %v622_v23  ;;  %v872_v28 = vsel %vm858_vm5, %v839_v15, %v606_v22  ;;  %v3034_v23 = vld [vmem:[%s4256_s3] ss:$0 sm:$0xff] }
 0x14a   : > { %v660_v40 = vpop.permute.xlu1 %659  ;;  %v644_v54 = vpop.permute.xlu0 %643 }
 0x14b   : > { %v921_v29 = vsel %vm891_vm6, %v888_v16, %v660_v40  ;;  %v905_v33 = vsel %vm891_vm6, %v872_v28, %v644_v54 }
 0x14e   : > { %v694_v43 = vpop.permute.xlu1 %693  ;;  %v678_v36 = vpop.permute.xlu0 %677 }
 0x14f   : > { %v954_v11 = vsel %vm924_vm7, %v921_v29, %v694_v43  ;;  %v938_v41 = vsel %vm924_vm7, %v905_v33, %v678_v36 }
 0x152   : > { %v734_v13 = vpop.permute.xlu1 %733  ;;  %v718_v30 = vpop.permute.xlu0 %717 }
 0x153   : > { %v977_v44 = vsel %vm957_vm8, %v938_v41, %v718_v30  ;;  %v1001_v58 = vsel %vm957_vm8, %v954_v11, %v734_v13 }
 0x154   : > { %1207 = vmatmul.mubr.bf16.gmra.mrb[24].mxu0 %v977_v44  ;;  %1271 = vmatmul.mubr.bf16.gmra.mrb[24].mxu1 %v1001_v58 }
 0x155   : > { %2062 = vmatprep.mubr.msk.bf16.mxu0 %vm743_vm2, %v2540_v57  ;;  %2070 = vmatprep.mubr.msk.bf16.mxu1 %vm743_vm2, %v742_v32 }
 0x156   : > { %v469_v60 = vpop.permute.xlu1 %468  ;;  %v453_v31 = vpop.permute.xlu0 %452 }
 0x157   : > { %v791_v2 = vsel %vm743_vm2, %v2650_v10, %v469_v60  ;;  %v767_v12 = vsel %vm743_vm2, %v2652_v61, %v453_v31 }
 0x15a   : > { %v550_v38 = vpop.permute.xlu1 %549  ;;  %v534_v21 = vpop.permute.xlu0 %533 }
 0x15b   : > { %v824_v57 = vsel %vm792_vm3, %v791_v2, %v550_v38  ;;  %v808_v50 = vsel %vm792_vm3, %v767_v12, %v534_v21 }
 0x15e   : > { %v584_v55 = vpop.permute.xlu1 %583  ;;  %v568_v45 = vpop.permute.xlu0 %567 }
 0x15f   : > { %v857_v14 = vsel %vm825_vm4, %v824_v57, %v584_v55  ;;  %v841_v17 = vsel %vm825_vm4, %v808_v50, %v568_v45 }
 0x162   : > { %v624_v46 = vpop.permute.xlu1 %623  ;;  %v608_v63 = vpop.permute.xlu0 %607 }
 0x163   : > { %v890_v52 = vsel %vm858_vm5, %v857_v14, %v624_v46  ;;  %v874_v4 = vsel %vm858_vm5, %v841_v17, %v608_v63 }
 0x166   : > { %v662_v5 = vpop.permute.xlu1 %661  ;;  %v646_v0 = vpop.permute.xlu0 %645 }
 0x167   : > { %v923_v62 = vsel %vm891_vm6, %v890_v52, %v662_v5  ;;  %v907_v10 = vsel %vm891_vm6, %v874_v4, %v646_v0 }
 0x16a   : > { %v696_v51 = vpop.permute.xlu1 %695  ;;  %v680_v37 = vpop.permute.xlu0 %679 }
 0x16b   : > { %v956_v61 = vsel %vm924_vm7, %v923_v62, %v696_v51  ;;  %v940_v53 = vsel %vm924_vm7, %v907_v10, %v680_v37 }
 0x16e   : > { %v736_v56 = vpop.permute.xlu1 %735  ;;  %v720_v6 = vpop.permute.xlu0 %719 }
 0x16f   : > { %v980_v18 = vsel %vm957_vm8, %v940_v53, %v720_v6  ;;  %v1004_v24 = vsel %vm957_vm8, %v956_v61, %v736_v56 }
 0x170   : > { %1215 = vmatmul.mubr.bf16.gmra.mrb[28].mxu0 %v980_v18  ;;  %1279 = vmatmul.mubr.bf16.gmra.mrb[28].mxu1 %v1004_v24 }
 0x180   : > { %v1160_v47 = vpop.f32.mrb[0].mxu0  ;;  %v1224_v34 = vpop.f32.mrb[0].mxu1 }
 0x181   : > { %v1162_v35 = vpop.f32.mrb[1].mxu0  ;;  %v1226_v59 = vpop.f32.mrb[1].mxu1  ;;  %v1310_v3 = vmul.f32 %v3027_v39, %v1224_v34  ;;  %v1294_v1 = vmul.f32 %v3027_v39, %v1160_v47 }
 0x182   : > { %v1163_v7 = vpop.f32.mrb[2].mxu0  ;;  %v1227_v8 = vpop.f32.mrb[2].mxu1 }
 0x183   : > { %v1165_v19 = vpop.f32.mrb[3].mxu0  ;;  %v1229_v9 = vpop.f32.mrb[3].mxu1  ;;  %v1311_v22 = vmul.f32 %v3027_v39, %v1227_v8  ;;  %v3038_v40 = vadd.f32 %v3034_v23, %v1310_v3  ;;  %v1295_v54 = vmul.f32 %v3027_v39, %v1163_v7  ;;  %v3042_v20 = vadd.f32 %v3034_v23, %v1294_v1 }
 0x185   : > { %v3045_v26 = vadd.f32 %v3034_v23, %v1311_v22  ;;  %v3048_v27 = vadd.f32 %v3034_v23, %v1295_v54  ;;  %v1632_v42 = vrot.slane %v3038_v40, 7  ;;  %v1618_v43 = vrot.slane %v3042_v20, 7 }
 0x186   : > { %v1432_v36 = vrot.slane %v3038_v40, 1  ;;  %v1418_v49 = vrot.slane %v3042_v20, 1  ;;  %v1564_v25 = vrot.slane %v3038_v40, 5  ;;  %v1550_v48 = vrot.slane %v3042_v20, 5 }
 0x187   : > { %v1466_v15 = vrot.slane %v3038_v40, 2  ;;  %v1452_v16 = vrot.slane %v3042_v20, 2  ;;  %v1598_v28 = vrot.slane %v3038_v40, 6  ;;  %v1584_v29 = vrot.slane %v3042_v20, 6 }
 0x188   : > { %v1500_v33 = vrot.slane %v3038_v40, 3  ;;  %v1486_v11 = vrot.slane %v3042_v20, 3  ;;  %v1712_v41 = vrot.slane %v3045_v26, 1  ;;  %v1698_v32 = vrot.slane %v3048_v27, 1 }
 0x189   : > { %v1844_v44 = vrot.slane %v3045_v26, 5  ;;  %v1830_v58 = vrot.slane %v3048_v27, 5  ;;  %v1746_v60 = vrot.slane %v3045_v26, 2  ;;  %v1732_v45 = vrot.slane %v3048_v27, 2 }
 0x18a   : > { %v1878_v46 = vrot.slane %v3045_v26, 6  ;;  %v1864_v0 = vrot.slane %v3048_v27, 6  ;;  %v1780_v2 = vrot.slane %v3045_v26, 3  ;;  %v1766_v12 = vrot.slane %v3048_v27, 3 }
 0x18b   : > { %v1912_v57 = vrot.slane %v3045_v26, 7  ;;  %v1898_v4 = vrot.slane %v3048_v27, 7  ;;  %v1534_v62 = vrot.slane %v3038_v40, 4  ;;  %v1520_v10 = vrot.slane %v3042_v20, 4 }
 0x18c   : > { %v1814_v61 = vrot.slane %v3045_v26, 4 }
 0x19c   : > { %v1168_v13 = vpop.f32.mrb[4].mxu0  ;;  %v1232_v30 = vpop.f32.mrb[4].mxu1 }
 0x19d   : > { %v1296_v31 = vmul.f32 %v3027_v39, %v1168_v13  ;;  %v1312_v38 = vmul.f32 %v3027_v39, %v1232_v30  ;;  %v1170_v21 = vpop.f32.mrb[5].mxu0  ;;  %v1234_v55 = vpop.f32.mrb[5].mxu1 }
 0x19e   : > { %v1171_v63 = vpop.f32.mrb[6].mxu0  ;;  %v1235_v5 = vpop.f32.mrb[6].mxu1 }
 0x19f   : > { %v3076_v50 = vadd.f32 %v3034_v23, %v1296_v31  ;;  %v3079_v51 = vadd.f32 %v3034_v23, %v1312_v38  ;;  %v1297_v37 = vmul.f32 %v3027_v39, %v1171_v63  ;;  %v1313_v14 = vmul.f32 %v3027_v39, %v1235_v5  ;;  %v1173_v17 = vpop.f32.mrb[7].mxu0  ;;  %v1237_v52 = vpop.f32.mrb[7].mxu1 }
 0x1a1   : > { %v3088_v53 = vadd.f32 %v3034_v23, %v1297_v37  ;;  %v1352_v56 = vadd.f32 %v3034_v23, %v1313_v14  ;;  %v1633_v6 = vrot.slane %v3079_v51, 6  ;;  %v1619_v18 = vrot.slane %v3076_v50, 6 }
 0x1a2   : > { %v3095_v24 = vsel %vm1382_vm9, %v3079_v51, %v1432_v36  ;;  %v3099_v47 = vsel %vm1382_vm9, %v3076_v50, %v1418_v49  ;;  %v1565_v34 = vrot.slane %v3079_v51, 4  ;;  %v1551_v35 = vrot.slane %v3076_v50, 4 }
 0x1a3   : > { %v3104_v59 = vsel %vm1382_vm9, %v1633_v6, %v1632_v42  ;;  %v3107_v7 = vsel %vm1382_vm9, %v1619_v18, %v1618_v43  ;;  %v1467_v8 = vrot.slane %v3079_v51, 1  ;;  %v1453_v19 = vrot.slane %v3076_v50, 1 }
 0x1a4   : > { %v3112_v9 = vsel %vm1382_vm9, %v1565_v34, %v1564_v25  ;;  %v3115_v3 = vsel %vm1382_vm9, %v1551_v35, %v1550_v48  ;;  %v1599_v1 = vrot.slane %v3079_v51, 5  ;;  %v1585_v22 = vrot.slane %v3076_v50, 5 }
 0x1a5   : > { %v3120_v54 = vsel %vm1382_vm9, %v1467_v8, %v1466_v15  ;;  %v3123_v42 = vsel %vm1382_vm9, %v1453_v19, %v1452_v16  ;;  %v1501_v43 = vrot.slane %v3079_v51, 2  ;;  %v1487_v36 = vrot.slane %v3076_v50, 2 }
 0x1a6   : > { %v3128_v49 = vsel %vm1382_vm9, %v1599_v1, %v1598_v28  ;;  %v3131_v25 = vsel %vm1382_vm9, %v1585_v22, %v1584_v29  ;;  %v3134_v48 = vsel %vm1382_vm9, %v1352_v56, %v1712_v41  ;;  %v3138_v15 = vsel %vm1382_vm9, %v3088_v53, %v1698_v32 }
 0x1a7   : > { %v3141_v16 = vsel %vm1382_vm9, %v1501_v43, %v1500_v33  ;;  %v3144_v13 = vsel %vm1382_vm9, %v1487_v36, %v1486_v11  ;;  %v1845_v30 = vrot.slane %v1352_v56, 4  ;;  %v1831_v28 = vrot.slane %v3088_v53, 4 }
 0x1a8   : > { %v1747_v31 = vrot.slane %v1352_v56, 1  ;;  %v1733_v29 = vrot.slane %v3088_v53, 1  ;;  %v1879_v38 = vrot.slane %v1352_v56, 5  ;;  %v1865_v41 = vrot.slane %v3088_v53, 5 }
 0x1a9   : > { %v3150_v21 = vsel %vm1382_vm9, %v1845_v30, %v1844_v44  ;;  %v3153_v32 = vsel %vm1382_vm9, %v1831_v28, %v1830_v58  ;;  %v1781_v33 = vrot.slane %v1352_v56, 2  ;;  %v1767_v55 = vrot.slane %v3088_v53, 2 }
 0x1aa   : > { %v3157_v11 = vsel %vm1382_vm9, %v1747_v31, %v1746_v60  ;;  %v3160_v63 = vsel %vm1382_vm9, %v1733_v29, %v1732_v45  ;;  %v3163_v5 = vsel %vm1382_vm9, %v1879_v38, %v1878_v46  ;;  %v3166_v37 = vsel %vm1382_vm9, %v1865_v41, %v1864_v0 }
 0x1ab   : > { %v3169_v44 = vsel %vm1382_vm9, %v1781_v33, %v1780_v2  ;;  %v3172_v58 = vsel %vm1382_vm9, %v1767_v55, %v1766_v12  ;;  %v1913_v14 = vrot.slane %v1352_v56, 6  ;;  %v1899_v17 = vrot.slane %v3088_v53, 6 }
 0x1ac   : > { %v1402_v60 = vrot.slane %v3079_v51, 7  ;;  %v1381_v45 = vrot.slane %v3076_v50, 7  ;;  %v1535_v52 = vrot.slane %v3079_v51, 3  ;;  %v1800_v46 = vrot.slane %v3048_v27, 4 }
 0x1ad   : > { %v3180_v0 = vsel %vm1382_vm9, %v1913_v14, %v1912_v57  ;;  %v3183_v2 = vsel %vm1382_vm9, %v1899_v17, %v1898_v4  ;;  %v1521_v12 = vrot.slane %v3076_v50, 3  ;;  %v1682_v6 = vrot.slane %v1352_v56, 7 }
 0x1ae   : > { %v3188_v18 = vsel %vm1382_vm9, %v1402_v60, %v3038_v40  ;;  %v3192_v34 = vsel %vm1382_vm9, %v1381_v45, %v3042_v20  ;;  %v3195_v51 = vsel %vm1382_vm9, %v1535_v52, %v1534_v62  ;;  %v1668_v57 = vrot.slane %v3088_v53, 7 }
 0x1af   : > { %v3199_v35 = vsel %vm1382_vm9, %v1521_v12, %v1520_v10  ;;  %v3203_v50 = vsel %vm1382_vm9, %v1682_v6, %v3045_v26  ;;  %v1815_v4 = vrot.slane %v1352_v56, 3  ;;  %v1801_v40 = vrot.slane %v3088_v53, 3 }
 0x1b0   : > { %v3208_v8 = vsel %vm1382_vm9, %v1668_v57, %v3048_v27 }
 0x1b1   : > { %v3213_v20 = vsel %vm1382_vm9, %v1815_v4, %v1814_v61  ;;  %v3216_v62 = vsel %vm1382_vm9, %v1801_v40, %v1800_v46 }
 0x1b8   : > { %v1176_v10 = vpop.f32.mrb[8].mxu0  ;;  %v1240_v19 = vpop.f32.mrb[8].mxu1 }
 0x1b9   : > { %v1298_v1 = vmul.f32 %v3027_v39, %v1176_v10  ;;  %v1314_v56 = vmul.f32 %v3027_v39, %v1240_v19  ;;  %v1178_v22 = vpop.f32.mrb[9].mxu0  ;;  %v1242_v53 = vpop.f32.mrb[9].mxu1 }
 0x1ba   : > { %v1179_v43 = vpop.f32.mrb[10].mxu0  ;;  %v1243_v36 = vpop.f32.mrb[10].mxu1 }
 0x1bb   : > { %v3221_v27 = vadd.f32 %v3034_v23, %v1298_v1  ;;  %v3224_v26 = vadd.f32 %v3034_v23, %v1314_v56  ;;  %v1299_v61 = vmul.f32 %v3027_v39, %v1179_v43  ;;  %v1315_v30 = vmul.f32 %v3027_v39, %v1243_v36  ;;  %v1181_v28 = vpop.f32.mrb[11].mxu0  ;;  %v1245_v31 = vpop.f32.mrb[11].mxu1 }
 0x1bd   : > { %v3229_v29 = vadd.f32 %v3034_v23, %v1299_v61  ;;  %v1354_v38 = vadd.f32 %v3034_v23, %v1315_v30  ;;  %v1635_v41 = vrot.slane %v3224_v26, 5  ;;  %v1621_v33 = vrot.slane %v3221_v27, 5 }
 0x1be   : > { %v1434_v55 = vrot.slane %v3224_v26, 7  ;;  %v1420_v14 = vrot.slane %v3221_v27, 7  ;;  %v1567_v17 = vrot.slane %v3224_v26, 3  ;;  %v1553_v60 = vrot.slane %v3221_v27, 3 }
 0x1bf   : > { %v3240_v45 = vsel %vm1385_vm10, %v1635_v41, %v3104_v59  ;;  %v3244_v52 = vsel %vm1385_vm10, %v1621_v33, %v3107_v7  ;;  %v3249_v46 = vsel %vm1385_vm10, %v3224_v26, %v3120_v54  ;;  %v3254_v12 = vsel %vm1385_vm10, %v3221_v27, %v3123_v42 }
 0x1c0   : > { %v3258_v6 = vsel %vm1385_vm10, %v1434_v55, %v3095_v24  ;;  %v3262_v59 = vsel %vm1385_vm10, %v1420_v14, %v3099_v47  ;;  %v3266_v7 = vsel %vm1385_vm10, %v1567_v17, %v3112_v9  ;;  %v3270_v54 = vsel %vm1385_vm10, %v1553_v60, %v3115_v3 }
 0x1c1   : > { %v1601_v57 = vrot.slane %v3224_v26, 4  ;;  %v1587_v42 = vrot.slane %v3221_v27, 4  ;;  %v1503_v4 = vrot.slane %v3224_v26, 1  ;;  %v1489_v24 = vrot.slane %v3221_v27, 1 }
 0x1c2   : > { %v1714_v40 = vrot.slane %v1354_v38, 7  ;;  %v1700_v47 = vrot.slane %v3229_v29, 7  ;;  %v1847_v10 = vrot.slane %v1354_v38, 3  ;;  %v1833_v19 = vrot.slane %v3229_v29, 3 }
 0x1c3   : > { %v3280_v9 = vsel %vm1385_vm10, %v1601_v57, %v3128_v49  ;;  %v3284_v3 = vsel %vm1385_vm10, %v1587_v42, %v3131_v25  ;;  %v3288_v1 = vsel %vm1385_vm10, %v1503_v4, %v3141_v16  ;;  %v3292_v56 = vsel %vm1385_vm10, %v1489_v24, %v3144_v13 }
 0x1c4   : > { %v3296_v22 = vsel %vm1385_vm10, %v1714_v40, %v3134_v48  ;;  %v3300_v49 = vsel %vm1385_vm10, %v1700_v47, %v3138_v15  ;;  %v3304_v25 = vsel %vm1385_vm10, %v1847_v10, %v3150_v21  ;;  %v3308_v16 = vsel %vm1385_vm10, %v1833_v19, %v3153_v32 }
 0x1c5   : > { %v3312_v13 = vsel %vm1385_vm10, %v1354_v38, %v3157_v11  ;;  %v3317_v48 = vsel %vm1385_vm10, %v3229_v29, %v3160_v63  ;;  %v1881_v53 = vrot.slane %v1354_v38, 4  ;;  %v1867_v15 = vrot.slane %v3229_v29, 4 }
 0x1c6   : > { %v1783_v43 = vrot.slane %v1354_v38, 1  ;;  %v1769_v21 = vrot.slane %v3229_v29, 1  ;;  %v1915_v36 = vrot.slane %v1354_v38, 5  ;;  %v1901_v61 = vrot.slane %v3229_v29, 5 }
 0x1c7   : > { %v3324_v32 = vsel %vm1385_vm10, %v1881_v53, %v3163_v5  ;;  %v3328_v11 = vsel %vm1385_vm10, %v1867_v15, %v3166_v37  ;;  %v1404_v63 = vrot.slane %v3224_v26, 6  ;;  %v1384_v30 = vrot.slane %v3221_v27, 6 }
 0x1c8   : > { %v3334_v28 = vsel %vm1385_vm10, %v1783_v43, %v3169_v44  ;;  %v3338_v31 = vsel %vm1385_vm10, %v1769_v21, %v3172_v58  ;;  %v3342_v5 = vsel %vm1385_vm10, %v1915_v36, %v3180_v0  ;;  %v3346_v37 = vsel %vm1385_vm10, %v1901_v61, %v3183_v2 }
 0x1c9   : > { %v3350_v41 = vsel %vm1385_vm10, %v1404_v63, %v3188_v18  ;;  %v3354_v44 = vsel %vm1385_vm10, %v1384_v30, %v3192_v34  ;;  %v1537_v33 = vrot.slane %v3224_v26, 2  ;;  %v1523_v58 = vrot.slane %v3221_v27, 2 }
 0x1ca   : > { %v1684_v55 = vrot.slane %v1354_v38, 6  ;;  %v1670_v0 = vrot.slane %v3229_v29, 6  ;;  %v1817_v14 = vrot.slane %v1354_v38, 2  ;;  %v1803_v17 = vrot.slane %v3229_v29, 2 }
 0x1cb   : > { %v3361_v2 = vsel %vm1385_vm10, %v1537_v33, %v3195_v51  ;;  %v3366_v18 = vsel %vm1385_vm10, %v1523_v58, %v3199_v35 }
 0x1cc   : > { %v3370_v34 = vsel %vm1385_vm10, %v1684_v55, %v3203_v50  ;;  %v3374_v27 = vsel %vm1385_vm10, %v1670_v0, %v3208_v8  ;;  %v3378_v26 = vsel %vm1385_vm10, %v1817_v14, %v3213_v20  ;;  %v3382_v51 = vsel %vm1385_vm10, %v1803_v17, %v3216_v62 }
 0x1d3   : > { %v1184_v29 = vpop.f32.mrb[12].mxu0  ;;  %v1248_v38 = vpop.f32.mrb[12].mxu1 }
 0x1d4   : > { %v1300_v35 = vmul.f32 %v3027_v39, %v1184_v29  ;;  %v1316_v60 = vmul.f32 %v3027_v39, %v1248_v38  ;;  %v1186_v50 = vpop.f32.mrb[13].mxu0  ;;  %v1250_v57 = vpop.f32.mrb[13].mxu1 }
 0x1d5   : > { %v1187_v42 = vpop.f32.mrb[14].mxu0  ;;  %v1251_v4 = vpop.f32.mrb[14].mxu1 }
 0x1d6   : > { %v3387_v8 = vadd.f32 %v3034_v23, %v1300_v35  ;;  %v1355_v20 = vadd.f32 %v3034_v23, %v1316_v60  ;;  %v1301_v24 = vmul.f32 %v3027_v39, %v1187_v42  ;;  %v1317_v62 = vmul.f32 %v3027_v39, %v1251_v4  ;;  %v1189_v40 = vpop.f32.mrb[15].mxu0  ;;  %v1253_v47 = vpop.f32.mrb[15].mxu1 }
 0x1d8   : > { %v3393_v10 = vadd.f32 %v3034_v23, %v1301_v24  ;;  %v1356_v19 = vadd.f32 %v3034_v23, %v1317_v62  ;;  %v1637_v53 = vrot.slane %v1355_v20, 4  ;;  %v1623_v15 = vrot.slane %v3387_v8, 4 }
 0x1d9   : > { %v1436_v43 = vrot.slane %v1355_v20, 6  ;;  %v1422_v21 = vrot.slane %v3387_v8, 6  ;;  %v1569_v36 = vrot.slane %v1355_v20, 2  ;;  %v1555_v61 = vrot.slane %v3387_v8, 2 }
 0x1da   : > { %v3401_v63 = vsel %vm1388_vm11, %v1637_v53, %v3240_v45  ;;  %v3405_v30 = vsel %vm1388_vm11, %v1623_v15, %v3244_v52  ;;  %v1470_v33 = vrot.slane %v1355_v20, 7  ;;  %v1456_v58 = vrot.slane %v3387_v8, 7 }
 0x1db   : > { %v3410_v55 = vsel %vm1388_vm11, %v1436_v43, %v3258_v6  ;;  %v3414_v0 = vsel %vm1388_vm11, %v1422_v21, %v3262_v59  ;;  %v3418_v14 = vsel %vm1388_vm11, %v1569_v36, %v3266_v7  ;;  %v3422_v45 = vsel %vm1388_vm11, %v1555_v61, %v3270_v54 }
 0x1dc   : > { %v3426_v52 = vsel %vm1388_vm11, %v1470_v33, %v3249_v46  ;;  %v3430_v6 = vsel %vm1388_vm11, %v1456_v58, %v3254_v12  ;;  %v1603_v17 = vrot.slane %v1355_v20, 3  ;;  %v1589_v59 = vrot.slane %v3387_v8, 3 }
 0x1dd   : > { %v3435_v29 = vsel %vm1388_vm11, %v1355_v20, %v3288_v1  ;;  %v3440_v7 = vsel %vm1388_vm11, %v3387_v8, %v3292_v56  ;;  %v1716_v54 = vrot.slane %v1356_v19, 6  ;;  %v1702_v46 = vrot.slane %v3393_v10, 6 }
 0x1de   : > { %v3445_v38 = vsel %vm1388_vm11, %v1603_v17, %v3280_v9  ;;  %v3449_v12 = vsel %vm1388_vm11, %v1589_v59, %v3284_v3  ;;  %v1849_v35 = vrot.slane %v1356_v19, 2  ;;  %v1835_v1 = vrot.slane %v3393_v10, 2 }
 0x1df   : > { %v3454_v60 = vsel %vm1388_vm11, %v1716_v54, %v3296_v22  ;;  %v3458_v56 = vsel %vm1388_vm11, %v1702_v46, %v3300_v49  ;;  %v1750_v50 = vrot.slane %v1356_v19, 7  ;;  %v1736_v57 = vrot.slane %v3393_v10, 7 }
 0x1e0   : > { %v3463_v9 = vsel %vm1388_vm11, %v1849_v35, %v3304_v25  ;;  %v3467_v3 = vsel %vm1388_vm11, %v1835_v1, %v3308_v16  ;;  %v1883_v42 = vrot.slane %v1356_v19, 3  ;;  %v1869_v4 = vrot.slane %v3393_v10, 3 }
 0x1e1   : > { %v3472_v22 = vsel %vm1388_vm11, %v1750_v50, %v3312_v13  ;;  %v3476_v49 = vsel %vm1388_vm11, %v1736_v57, %v3317_v48  ;;  %v3480_v24 = vsel %vm1388_vm11, %v1356_v19, %v3334_v28  ;;  %v3485_v25 = vsel %vm1388_vm11, %v3393_v10, %v3338_v31 }
 0x1e2   : > { %v3489_v16 = vsel %vm1388_vm11, %v1883_v42, %v3324_v32  ;;  %v3493_v13 = vsel %vm1388_vm11, %v1869_v4, %v3328_v11  ;;  %v1917_v62 = vrot.slane %v1356_v19, 4  ;;  %v1903_v48 = vrot.slane %v3393_v10, 4 }
 0x1e3   : > { %v1406_v40 = vrot.slane %v1355_v20, 5  ;;  %v1387_v28 = vrot.slane %v3387_v8, 5  ;;  %v1539_v47 = vrot.slane %v1355_v20, 1  ;;  %v1525_v53 = vrot.slane %v3387_v8, 1 }
 0x1e4   : > { %v3500_v31 = vsel %vm1388_vm11, %v1917_v62, %v3342_v5  ;;  %v3504_v32 = vsel %vm1388_vm11, %v1903_v48, %v3346_v37  ;;  %v1686_v15 = vrot.slane %v1356_v19, 5  ;;  %v1672_v11 = vrot.slane %v3393_v10, 5 }
 0x1e5   : > { %v3509_v43 = vsel %vm1388_vm11, %v1406_v40, %v3350_v41  ;;  %v3513_v20 = vsel %vm1388_vm11, %v1387_v28, %v3354_v44  ;;  %v3517_v8 = vsel %vm1388_vm11, %v1539_v47, %v3361_v2  ;;  %v3521_v5 = vsel %vm1388_vm11, %v1525_v53, %v3366_v18 }
 0x1e6   : > { %v3525_v37 = vsel %vm1388_vm11, %v1686_v15, %v3370_v34  ;;  %v3529_v41 = vsel %vm1388_vm11, %v1672_v11, %v3374_v27  ;;  %v1819_v21 = vrot.slane %v1356_v19, 1  ;;  %v1805_v44 = vrot.slane %v3393_v10, 1 }
 0x1e8   : > { %v3534_v36 = vsel %vm1388_vm11, %v1819_v21, %v3378_v26  ;;  %v3538_v2 = vsel %vm1388_vm11, %v1805_v44, %v3382_v51 }
 0x1ef   : > { %v1192_v18 = vpop.f32.mrb[16].mxu0  ;;  %v1256_v61 = vpop.f32.mrb[16].mxu1 }
 0x1f0   : > { %v1302_v34 = vmul.f32 %v3027_v39, %v1192_v18  ;;  %v1318_v33 = vmul.f32 %v3027_v39, %v1256_v61  ;;  %v1194_v58 = vpop.f32.mrb[17].mxu0  ;;  %v1258_v27 = vpop.f32.mrb[17].mxu1 }
 0x1f1   : > { %v1195_v17 = vpop.f32.mrb[18].mxu0  ;;  %v1259_v19 = vpop.f32.mrb[18].mxu1 }
 0x1f2   : > { %v3543_v10 = vadd.f32 %v3034_v23, %v1302_v34  ;;  %v3546_v26 = vadd.f32 %v3034_v23, %v1318_v33  ;;  %v1303_v59 = vmul.f32 %v3027_v39, %v1195_v17  ;;  %v1319_v51 = vmul.f32 %v3027_v39, %v1259_v19  ;;  %v1197_v54 = vpop.f32.mrb[19].mxu0  ;;  %v1261_v46 = vpop.f32.mrb[19].mxu1 }
 0x1f4   : > { %v3551_v35 = vadd.f32 %v3034_v23, %v1303_v59  ;;  %v1358_v1 = vadd.f32 %v3034_v23, %v1319_v51  ;;  %v1639_v50 = vrot.slane %v3546_v26, 3  ;;  %v1625_v57 = vrot.slane %v3543_v10, 3 }
 0x1f5   : > { %v1438_v42 = vrot.slane %v3546_v26, 5  ;;  %v1424_v4 = vrot.slane %v3543_v10, 5  ;;  %v1571_v62 = vrot.slane %v3546_v26, 1  ;;  %v1557_v48 = vrot.slane %v3543_v10, 1 }
 0x1f6   : > { %v3562_v40 = vsel %vm1391_vm12, %v1639_v50, %v3401_v63  ;;  %v3566_v28 = vsel %vm1391_vm12, %v1625_v57, %v3405_v30  ;;  %v1472_v47 = vrot.slane %v3546_v26, 6  ;;  %v1458_v53 = vrot.slane %v3543_v10, 6 }
 0x1f7   : > { %v3572_v15 = vsel %vm1391_vm12, %v1438_v42, %v3410_v55  ;;  %v3576_v11 = vsel %vm1391_vm12, %v1424_v4, %v3414_v0  ;;  %v3580_v63 = vsel %vm1391_vm12, %v1571_v62, %v3418_v14  ;;  %v3584_v30 = vsel %vm1391_vm12, %v1557_v48, %v3422_v45 }
 0x1f8   : > { %v3588_v21 = vsel %vm1391_vm12, %v1472_v47, %v3426_v52  ;;  %v3592_v55 = vsel %vm1391_vm12, %v1458_v53, %v3430_v6  ;;  %v1605_v44 = vrot.slane %v3546_v26, 2  ;;  %v1591_v0 = vrot.slane %v3543_v10, 2 }
 0x1f9   : > { %v1506_v18 = vrot.slane %v3546_v26, 7  ;;  %v1492_v14 = vrot.slane %v3543_v10, 7  ;;  %v1718_v61 = vrot.slane %v1358_v1, 5  ;;  %v1704_v45 = vrot.slane %v3551_v35, 5 }
 0x1fa   : > { %v3601_v34 = vsel %vm1391_vm12, %v1605_v44, %v3445_v38  ;;  %v3605_v52 = vsel %vm1391_vm12, %v1591_v0, %v3449_v12  ;;  %v1851_v6 = vrot.slane %v1358_v1, 1  ;;  %v1837_v33 = vrot.slane %v3551_v35, 1 }
 0x1fb   : > { %v3610_v58 = vsel %vm1391_vm12, %v1506_v18, %v3435_v29  ;;  %v3614_v27 = vsel %vm1391_vm12, %v1492_v14, %v3440_v7  ;;  %v3618_v17 = vsel %vm1391_vm12, %v1718_v61, %v3454_v60  ;;  %v3622_v38 = vsel %vm1391_vm12, %v1704_v45, %v3458_v56 }
 0x1fc   : > { %v3626_v12 = vsel %vm1391_vm12, %v1851_v6, %v3463_v9  ;;  %v3630_v29 = vsel %vm1391_vm12, %v1837_v33, %v3467_v3  ;;  %v1752_v19 = vrot.slane %v1358_v1, 6  ;;  %v1738_v7 = vrot.slane %v3551_v35, 6 }
 0x1fd   : > { %v1885_v59 = vrot.slane %v1358_v1, 2  ;;  %v1871_v51 = vrot.slane %v3551_v35, 2  ;;  %v1786_v60 = vrot.slane %v1358_v1, 7  ;;  %v1772_v54 = vrot.slane %v3551_v35, 7 }
 0x1fe   : > { %v3637_v56 = vsel %vm1391_vm12, %v1752_v19, %v3472_v22  ;;  %v3641_v9 = vsel %vm1391_vm12, %v1738_v7, %v3476_v49  ;;  %v1919_v46 = vrot.slane %v1358_v1, 3  ;;  %v1905_v3 = vrot.slane %v3551_v35, 3 }
 0x1ff   : > { %v3646_v50 = vsel %vm1391_vm12, %v1885_v59, %v3489_v16  ;;  %v3650_v57 = vsel %vm1391_vm12, %v1871_v51, %v3493_v13  ;;  %v3654_v42 = vsel %vm1391_vm12, %v1786_v60, %v3480_v24  ;;  %v3658_v22 = vsel %vm1391_vm12, %v1772_v54, %v3485_v25 }
 0x200   : > { %v3662_v49 = vsel %vm1391_vm12, %v1919_v46, %v3500_v31  ;;  %v3666_v16 = vsel %vm1391_vm12, %v1905_v3, %v3504_v32  ;;  %v1408_v4 = vrot.slane %v3546_v26, 4  ;;  %v1390_v13 = vrot.slane %v3543_v10, 4 }
 0x201   : > { %v3673_v24 = vsel %vm1391_vm12, %v3546_v26, %v3517_v8  ;;  %v3678_v25 = vsel %vm1391_vm12, %v3543_v10, %v3521_v5  ;;  %v1688_v31 = vrot.slane %v1358_v1, 4  ;;  %v1674_v62 = vrot.slane %v3551_v35, 4 }
 0x202   : > { %v3683_v32 = vsel %vm1391_vm12, %v1408_v4, %v3509_v43  ;;  %v3687_v48 = vsel %vm1391_vm12, %v1390_v13, %v3513_v20  ;;  %v3691_v8 = vsel %vm1391_vm12, %v1358_v1, %v3534_v36  ;;  %v3696_v5 = vsel %vm1391_vm12, %v3551_v35, %v3538_v2 }
 0x203   : > { %v3700_v10 = vsel %vm1391_vm12, %v1688_v31, %v3525_v37  ;;  %v3704_v43 = vsel %vm1391_vm12, %v1674_v62, %v3529_v41 }
 0x20b   : > { %v1200_v26 = vpop.f32.mrb[20].mxu0  ;;  %v1264_v20 = vpop.f32.mrb[20].mxu1 }
 0x20c   : > { %v1304_v47 = vmul.f32 %v3027_v39, %v1200_v26  ;;  %v1320_v36 = vmul.f32 %v3027_v39, %v1264_v20  ;;  %v1202_v1 = vpop.f32.mrb[21].mxu0  ;;  %v1266_v53 = vpop.f32.mrb[21].mxu1 }
 0x20d   : > { %v1203_v44 = vpop.f32.mrb[22].mxu0  ;;  %v1267_v0 = vpop.f32.mrb[22].mxu1 }
 0x20e   : > { %v3709_v2 = vadd.f32 %v3034_v23, %v1304_v47  ;;  %v3712_v37 = vadd.f32 %v3034_v23, %v1320_v36  ;;  %v1305_v41 = vmul.f32 %v3027_v39, %v1203_v44  ;;  %v1321_v35 = vmul.f32 %v3027_v39, %v1267_v0  ;;  %v1205_v18 = vpop.f32.mrb[23].mxu0  ;;  %v1269_v14 = vpop.f32.mrb[23].mxu1 }
 0x210   : > { %v3717_v61 = vadd.f32 %v3034_v23, %v1305_v41  ;;  %v1360_v45 = vadd.f32 %v3034_v23, %v1321_v35  ;;  %v1641_v6 = vrot.slane %v3712_v37, 2  ;;  %v1627_v33 = vrot.slane %v3709_v2, 2 }
 0x211   : > { %v1440_v19 = vrot.slane %v3712_v37, 4  ;;  %v1426_v7 = vrot.slane %v3709_v2, 4  ;;  %v3727_v59 = vsel %vm1394_vm13, %v3712_v37, %v3580_v63  ;;  %v3732_v51 = vsel %vm1394_vm13, %v3709_v2, %v3584_v30 }
 0x212   : > { %v3736_v60 = vsel %vm1394_vm13, %v1641_v6, %v3562_v40  ;;  %v3740_v54 = vsel %vm1394_vm13, %v1627_v33, %v3566_v28  ;;  %v1474_v46 = vrot.slane %v3712_v37, 5  ;;  %v1460_v3 = vrot.slane %v3709_v2, 5 }
 0x213   : > { %v3746_v63 = vsel %vm1394_vm13, %v1440_v19, %v3572_v15  ;;  %v3750_v30 = vsel %vm1394_vm13, %v1426_v7, %v3576_v11  ;;  %v1607_v4 = vrot.slane %v3712_v37, 1  ;;  %v1593_v40 = vrot.slane %v3709_v2, 1 }
 0x214   : > { %v3756_v28 = vsel %vm1394_vm13, %v1474_v46, %v3588_v21  ;;  %v3760_v13 = vsel %vm1394_vm13, %v1460_v3, %v3592_v55  ;;  %v1508_v31 = vrot.slane %v3712_v37, 6  ;;  %v1494_v15 = vrot.slane %v3709_v2, 6 }
 0x215   : > { %v3766_v11 = vsel %vm1394_vm13, %v1607_v4, %v3601_v34  ;;  %v3770_v62 = vsel %vm1394_vm13, %v1593_v40, %v3605_v52  ;;  %v1720_v26 = vrot.slane %v1360_v45, 4  ;;  %v1706_v21 = vrot.slane %v3717_v61, 4 }
 0x216   : > { %v3775_v20 = vsel %vm1394_vm13, %v1508_v31, %v3610_v58  ;;  %v3779_v55 = vsel %vm1394_vm13, %v1494_v15, %v3614_v27  ;;  %v3783_v47 = vsel %vm1394_vm13, %v1360_v45, %v3626_v12  ;;  %v3788_v34 = vsel %vm1394_vm13, %v3717_v61, %v3630_v29 }
 0x217   : > { %v3792_v52 = vsel %vm1394_vm13, %v1720_v26, %v3618_v17  ;;  %v3796_v58 = vsel %vm1394_vm13, %v1706_v21, %v3622_v38  ;;  %v1754_v36 = vrot.slane %v1360_v45, 5  ;;  %v1740_v27 = vrot.slane %v3717_v61, 5 }
 0x218   : > { %v1887_v1 = vrot.slane %v1360_v45, 1  ;;  %v1873_v12 = vrot.slane %v3717_v61, 1  ;;  %v1788_v53 = vrot.slane %v1360_v45, 6  ;;  %v1774_v44 = vrot.slane %v3717_v61, 6 }
 0x219   : > { %v3803_v29 = vsel %vm1394_vm13, %v1754_v36, %v3637_v56  ;;  %v3807_v17 = vsel %vm1394_vm13, %v1740_v27, %v3641_v9  ;;  %v1921_v0 = vrot.slane %v1360_v45, 2  ;;  %v1907_v38 = vrot.slane %v3717_v61, 2 }
 0x21a   : > { %v3812_v41 = vsel %vm1394_vm13, %v1887_v1, %v3646_v50  ;;  %v3816_v35 = vsel %vm1394_vm13, %v1873_v12, %v3650_v57  ;;  %v3820_v18 = vsel %vm1394_vm13, %v1788_v53, %v3654_v42  ;;  %v3824_v56 = vsel %vm1394_vm13, %v1774_v44, %v3658_v22 }
 0x21b   : > { %v3828_v9 = vsel %vm1394_vm13, %v1921_v0, %v3662_v49  ;;  %v3832_v50 = vsel %vm1394_vm13, %v1907_v38, %v3666_v16  ;;  %v1410_v14 = vrot.slane %v3712_v37, 3  ;;  %v1393_v57 = vrot.slane %v3709_v2, 3 }
 0x21c   : > { %v1542_v6 = vrot.slane %v3712_v37, 7  ;;  %v1528_v42 = vrot.slane %v3709_v2, 7  ;;  %v1690_v33 = vrot.slane %v1360_v45, 3  ;;  %v1676_v22 = vrot.slane %v3717_v61, 3 }
 0x21d   : > { %v3841_v19 = vsel %vm1394_vm13, %v1410_v14, %v3683_v32  ;;  %v3845_v49 = vsel %vm1394_vm13, %v1393_v57, %v3687_v48  ;;  %v1822_v16 = vrot.slane %v1360_v45, 7  ;;  %v1808_v7 = vrot.slane %v3717_v61, 7 }
 0x21e   : > { %v3850_v46 = vsel %vm1394_vm13, %v1542_v6, %v3673_v24  ;;  %v3854_v2 = vsel %vm1394_vm13, %v1528_v42, %v3678_v25  ;;  %v3858_v37 = vsel %vm1394_vm13, %v1690_v33, %v3700_v10  ;;  %v3862_v32 = vsel %vm1394_vm13, %v1676_v22, %v3704_v43 }
 0x21f   : > { %v3866_v48 = vsel %vm1394_vm13, %v1822_v16, %v3691_v8  ;;  %v3870_v24 = vsel %vm1394_vm13, %v1808_v7, %v3696_v5 }
 0x227   : > { %v1208_v61 = vpop.f32.mrb[24].mxu0  ;;  %v1272_v45 = vpop.f32.mrb[24].mxu1 }
 0x228   : > { %v1306_v25 = vmul.f32 %v3027_v39, %v1208_v61  ;;  %v1322_v3 = vmul.f32 %v3027_v39, %v1272_v45  ;;  %v1210_v10 = vpop.f32.mrb[25].mxu0  ;;  %v1274_v4 = vpop.f32.mrb[25].mxu1 }
 0x229   : > { %v1211_v40 = vpop.f32.mrb[26].mxu0  ;;  %v1275_v31 = vpop.f32.mrb[26].mxu1 }
 0x22a   : > { %v1345_v43 = vadd.f32 %v3034_v23, %v1306_v25  ;;  %v1361_v15 = vadd.f32 %v3034_v23, %v1322_v3  ;;  %v1307_v8 = vmul.f32 %v3027_v39, %v1211_v40  ;;  %v1323_v26 = vmul.f32 %v3027_v39, %v1275_v31  ;;  %v1213_v5 = vpop.f32.mrb[27].mxu0  ;;  %v1277_v21 = vpop.f32.mrb[27].mxu1 }
 0x22c   : > { %v3879_v36 = vadd.f32 %v3034_v23, %v1307_v8  ;;  %v1362_v27 = vadd.f32 %v3034_v23, %v1323_v26  ;;  %v1643_v1 = vrot.slane %v1361_v15, 1  ;;  %v1629_v12 = vrot.slane %v1345_v43, 1 }
 0x22d   : > { %v1442_v53 = vrot.slane %v1361_v15, 3  ;;  %v1428_v44 = vrot.slane %v1345_v43, 3  ;;  %v1574_v0 = vrot.slane %v1361_v15, 7  ;;  %v1560_v38 = vrot.slane %v1345_v43, 7 }
 0x22e   : > { %v3884_v14 = vsel %vm1397_vm14, %v1643_v1, %v3736_v60  ;;  %v3888_v57 = vsel %vm1397_vm14, %v1629_v12, %v3740_v54  ;;  %v1476_v6 = vrot.slane %v1361_v15, 4  ;;  %v1462_v42 = vrot.slane %v1345_v43, 4 }
 0x22f   : > { %v3892_v33 = vsel %vm1397_vm14, %v1442_v53, %v3746_v63  ;;  %v3896_v22 = vsel %vm1397_vm14, %v1428_v44, %v3750_v30  ;;  %v3900_v16 = vsel %vm1397_vm14, %v1574_v0, %v3727_v59  ;;  %v3904_v60 = vsel %vm1397_vm14, %v1560_v38, %v3732_v51 }
 0x230   : > { %v3908_v54 = vsel %vm1397_vm14, %v1476_v6, %v3756_v28  ;;  %v3912_v63 = vsel %vm1397_vm14, %v1462_v42, %v3760_v13  ;;  %v3916_v30 = vsel %vm1397_vm14, %v1361_v15, %v3766_v11  ;;  %v3920_v59 = vsel %vm1397_vm14, %v1345_v43, %v3770_v62 }
 0x231   : > { %v1510_v7 = vrot.slane %v1361_v15, 5  ;;  %v1496_v61 = vrot.slane %v1345_v43, 5  ;;  %v1722_v51 = vrot.slane %v1362_v27, 3  ;;  %v1708_v45 = vrot.slane %v3879_v36, 3 }
 0x232   : > { %v1854_v25 = vrot.slane %v1362_v27, 7  ;;  %v1840_v28 = vrot.slane %v3879_v36, 7  ;;  %v1756_v3 = vrot.slane %v1362_v27, 4  ;;  %v1742_v13 = vrot.slane %v3879_v36, 4 }
 0x233   : > { %v3927_v10 = vsel %vm1397_vm14, %v1510_v7, %v3775_v20  ;;  %v3931_v11 = vsel %vm1397_vm14, %v1496_v61, %v3779_v55  ;;  %v3935_v62 = vsel %vm1397_vm14, %v1722_v51, %v3792_v52  ;;  %v3939_v4 = vsel %vm1397_vm14, %v1708_v45, %v3796_v58  ;;  %v2155_v61 = vld [vmem:[%s4255_s2] ss:$0 sm:$0xff] }
 0x234   : > { %v3943_v40 = vsel %vm1397_vm14, %v1854_v25, %v3783_v47  ;;  %v3947_v20 = vsel %vm1397_vm14, %v1840_v28, %v3788_v34  ;;  %v3951_v55 = vsel %vm1397_vm14, %v1756_v3, %v3803_v29  ;;  %v3955_v52 = vsel %vm1397_vm14, %v1742_v13, %v3807_v17  ;;  %v2156_v28 = vld [vmem:[%s4256_s3] ss:$0 sm:$0xff] }
 0x235   : > { %v3959_v58 = vsel %vm1397_vm14, %v1362_v27, %v3812_v41  ;;  %v3964_v47 = vsel %vm1397_vm14, %v3879_v36, %v3816_v35  ;;  %v1790_v31 = vrot.slane %v1362_v27, 5  ;;  %v1776_v34 = vrot.slane %v3879_v36, 5 }
 0x236   : > { %v1923_v8 = vrot.slane %v1362_v27, 1  ;;  %v1909_v29 = vrot.slane %v3879_v36, 1  ;;  %v1412_v26 = vrot.slane %v1361_v15, 2  ;;  %v1396_v5 = vrot.slane %v1345_v43, 2 }
 0x237   : > { %v3970_v17 = vsel %vm1397_vm14, %v1790_v31, %v3820_v18  ;;  %v3974_v41 = vsel %vm1397_vm14, %v1776_v34, %v3824_v56  ;;  %v1544_v21 = vrot.slane %v1361_v15, 6  ;;  %v1530_v1 = vrot.slane %v1345_v43, 6 }
 0x238   : > { %v3978_v35 = vsel %vm1397_vm14, %v1923_v8, %v3828_v9  ;;  %v3982_v12 = vsel %vm1397_vm14, %v1909_v29, %v3832_v50  ;;  %v3986_v53 = vsel %vm1397_vm14, %v1412_v26, %v3841_v19  ;;  %v3990_v18 = vsel %vm1397_vm14, %v1396_v5, %v3845_v49 }
 0x239   : > { %v3994_v56 = vsel %vm1397_vm14, %v1544_v21, %v3850_v46  ;;  %v3998_v9 = vsel %vm1397_vm14, %v1530_v1, %v3854_v2  ;;  %v1692_v43 = vrot.slane %v1362_v27, 2  ;;  %v1678_v50 = vrot.slane %v3879_v36, 2 }
 0x23a   : > { %v1824_v15 = vrot.slane %v1362_v27, 6  ;;  %v1810_v44 = vrot.slane %v3879_v36, 6 }
 0x23b   : > { %v4004_v19 = vsel %vm1397_vm14, %v1692_v43, %v3858_v37  ;;  %v4008_v49 = vsel %vm1397_vm14, %v1678_v50, %v3862_v32 }
 0x23c   : > { %v4012_v46 = vsel %vm1397_vm14, %v1824_v15, %v3866_v48  ;;  %v4016_v2 = vsel %vm1397_vm14, %v1810_v44, %v3870_v24 }
 0x243   : > { %v1216_v0 = vpop.f32.mrb[28].mxu0  ;;  %v1280_v27 = vpop.f32.mrb[28].mxu1 }
 0x244   : > { %v1308_v36 = vmul.f32 %v3027_v39, %v1216_v0  ;;  %v1324_v38 = vmul.f32 %v3027_v39, %v1280_v27  ;;  %v1218_v37 = vpop.f32.mrb[29].mxu0  ;;  %v1282_v6 = vpop.f32.mrb[29].mxu1 }
 0x245   : > { %v1219_v42 = vpop.f32.mrb[30].mxu0  ;;  %v1283_v7 = vpop.f32.mrb[30].mxu1 }
 0x246   : > { %v4021_v32 = vadd.f32 %v3034_v23, %v1308_v36  ;;  %v4024_v48 = vadd.f32 %v3034_v23, %v1324_v38  ;;  %v1309_v24 = vmul.f32 %v3027_v39, %v1219_v42  ;;  %v1325_v51 = vmul.f32 %v2155_v61, %v1283_v7  ;;  %v1221_v45 = vpop.f32.mrb[31].mxu0  ;;  %v1285_v25 = vpop.f32.mrb[31].mxu1 }
 0x248   : > { %v4033_v3 = vadd.f32 %v2156_v28, %v1309_v24  ;;  %v4035_v13 = vadd.f32 %v2156_v28, %v1325_v51  ;;  %v1645_v23 = vsel %vm1400_vm15, %v4024_v48, %v3884_v14  ;;  %v1631_v39 = vsel %vm1400_vm15, %v4021_v32, %v3888_v57 }
 0x249   : > { %1648 = vrot.lane.b32.xlu1 %v1645_v23, %s2227_s8  ;;  %1646 = vrot.lane.b32.xlu0 %v1631_v39, %s2227_s8  ;;  %v1444_v31 = vrot.slane %v4024_v48, 2  ;;  %v1430_v34 = vrot.slane %v4021_v32, 2  ;;  %v1576_v8 = vrot.slane %v4024_v48, 6  ;;  %v1562_v29 = vrot.slane %v4021_v32, 6 }
 0x24a   : > { %v1478_v26 = vrot.slane %v4024_v48, 3  ;;  %v1464_v14 = vrot.slane %v4021_v32, 3  ;;  %v1610_v5 = vrot.slane %v4024_v48, 7  ;;  %v1596_v57 = vrot.slane %v4021_v32, 7 }
 0x24b   : > { %v1445_v21 = vsel %vm1400_vm15, %v1444_v31, %v3892_v33  ;;  %v1431_v1 = vsel %vm1400_vm15, %v1430_v34, %v3896_v22  ;;  %v1577_v43 = vsel %vm1400_vm15, %v1576_v8, %v3900_v16  ;;  %v1563_v50 = vsel %vm1400_vm15, %v1562_v29, %v3904_v60 }
 0x24c   : > { %v1479_v15 = vsel %vm1400_vm15, %v1478_v26, %v3908_v54  ;;  %v1465_v44 = vsel %vm1400_vm15, %v1464_v14, %v3912_v63  ;;  %v1611_v0 = vsel %vm1400_vm15, %v1610_v5, %v3916_v30  ;;  %v1597_v33 = vsel %vm1400_vm15, %v1596_v57, %v3920_v59 }
 0x24d   : > { %1448 = vrot.lane.b32.xlu1 %v1445_v21, %s2223_s23  ;;  %1446 = vrot.lane.b32.xlu0 %v1431_v1, %s2223_s23  ;;  %v1512_v22 = vrot.slane %v4024_v48, 4  ;;  %v1498_v16 = vrot.slane %v4021_v32, 4  ;;  %v1724_v60 = vrot.slane %v4035_v13, 2  ;;  %v1710_v54 = vrot.slane %v4033_v3, 2 }
 0x24e   : > { %v1856_v63 = vrot.slane %v4035_v13, 6  ;;  %v1842_v27 = vrot.slane %v4033_v3, 6  ;;  %v1758_v30 = vrot.slane %v4035_v13, 3  ;;  %v1744_v59 = vrot.slane %v4033_v3, 3 }
 0x24f   : > { %v1513_v36 = vsel %vm1400_vm15, %v1512_v22, %v3927_v10  ;;  %v1499_v38 = vsel %vm1400_vm15, %v1498_v16, %v3931_v11  ;;  %v1725_v37 = vsel %vm1400_vm15, %v1724_v60, %v3935_v62  ;;  %v1711_v6 = vsel %vm1400_vm15, %v1710_v54, %v3939_v4 }
 0x250   : > { %v1857_v42 = vsel %vm1400_vm15, %v1856_v63, %v3943_v40  ;;  %v1843_v7 = vsel %vm1400_vm15, %v1842_v27, %v3947_v20  ;;  %v1759_v24 = vsel %vm1400_vm15, %v1758_v30, %v3951_v55  ;;  %v1745_v10 = vsel %vm1400_vm15, %v1744_v59, %v3955_v52 }
 0x251   : > { %1580 = vrot.lane.b32.xlu1 %v1577_v43, %s2223_s23  ;;  %1578 = vrot.lane.b32.xlu0 %v1563_v50, %s2223_s23  ;;  %v1890_v11 = vrot.slane %v4035_v13, 7  ;;  %v1876_v62 = vrot.slane %v4033_v3, 7  ;;  %v1792_v4 = vrot.slane %v4035_v13, 4  ;;  %v1778_v40 = vrot.slane %v4033_v3, 4 }
 0x252   : > { %v1925_v20 = vsel %vm1400_vm15, %v4035_v13, %v3978_v35  ;;  %v1911_v55 = vsel %vm1400_vm15, %v4033_v3, %v3982_v12  ;;  %v1414_v52 = vrot.slane %v4024_v48, 1  ;;  %v1399_v61 = vrot.slane %v4021_v32, 1 }
 0x253   : > { %v1891_v51 = vsel %vm1400_vm15, %v1890_v11, %v3959_v58  ;;  %v1877_v45 = vsel %vm1400_vm15, %v1876_v62, %v3964_v47  ;;  %v1793_v25 = vsel %vm1400_vm15, %v1792_v4, %v3970_v17  ;;  %v1779_v35 = vsel %vm1400_vm15, %v1778_v40, %v3974_v41 }
 0x254   : > { %v1415_v28 = vsel %vm1400_vm15, %v1414_v52, %v3986_v53  ;;  %v1401_v12 = vsel %vm1400_vm15, %v1399_v61, %v3990_v18  ;;  %v1546_v23 = vrot.slane %v4024_v48, 5  ;;  %v1532_v39 = vrot.slane %v4021_v32, 5 }
 0x255   : > { %1482 = vrot.lane.b32.xlu1 %v1479_v15, %s2225_s28  ;;  %1480 = vrot.lane.b32.xlu0 %v1465_v44, %s2225_s28  ;;  %v1694_v58 = vrot.slane %v4035_v13, 1  ;;  %v1680_v47 = vrot.slane %v4033_v3, 1  ;;  %v1826_v17 = vrot.slane %v4035_v13, 5  ;;  %v1812_v41 = vrot.slane %v4033_v3, 5 }
 0x256   : > { %v1547_v53 = vsel %vm1400_vm15, %v1546_v23, %v3994_v56  ;;  %v1533_v18 = vsel %vm1400_vm15, %v1532_v39, %v3998_v9 }
 0x257   : > { %v1695_v32 = vsel %vm1400_vm15, %v1694_v58, %v4004_v19  ;;  %v1681_v48 = vsel %vm1400_vm15, %v1680_v47, %v4008_v49  ;;  %v4139_v31 = vsel %vm1400_vm15, %v1826_v17, %v4012_v46  ;;  %v4143_v13 = vsel %vm1400_vm15, %v1812_v41, %v4016_v2 }
 0x259   : > { %1614 = vrot.lane.b32.xlu1 %v1611_v0, %s2225_s28  ;;  %1612 = vrot.lane.b32.xlu0 %v1597_v33, %s2225_s28 }
 0x25d   : > { %1516 = vrot.lane.b32.xlu1 %v1513_v36, %s2227_s8  ;;  %1514 = vrot.lane.b32.xlu0 %v1499_v38, %s2227_s8 }
 0x261   : > { %1728 = vrot.lane.b32.xlu1 %v1725_v37, %s2223_s23  ;;  %1726 = vrot.lane.b32.xlu0 %v1711_v6, %s2223_s23 }
 0x265   : > { %1860 = vrot.lane.b32.xlu1 %v1857_v42, %s2223_s23  ;;  %1858 = vrot.lane.b32.xlu0 %v1843_v7, %s2223_s23 }
 0x269   : > { %1762 = vrot.lane.b32.xlu1 %v1759_v24, %s2225_s28  ;;  %1760 = vrot.lane.b32.xlu0 %v1745_v10, %s2225_s28 }
 0x26d   : > { %1894 = vrot.lane.b32.xlu1 %v1891_v51, %s2225_s28  ;;  %1892 = vrot.lane.b32.xlu0 %v1877_v45, %s2225_s28  ;;  %s4172_s28 = scalar_lea.vmem [#allocation2], %s2044_s9 }
 0x26e   : > { %s1978_s10 = sshll.u32 %s4172_s28, 4  ;;  %s4203_s10 = int_to_ptr.vmem [resolvable:$true] %s1978_s10 }
 0x26f   : > { %s2157_s11 = scalar_lea.vmem %s4203_s10, 1024  ;;  %p2164_p0 = scmp.lt.s32.totalorder %s4203_s10, %s2162_s22 }
 0x270   : > { %p2158_p11 = scmp.ne.s32.totalorder %s4203_s10, %s2157_s11  ;;  %p2165_p1 = scmp.lt.s32.totalorder %s2163_s27, %s2157_s11 }
 0x271   : > { %1796 = vrot.lane.b32.xlu1 %v1793_v25, %s2227_s8  ;;  %1794 = vrot.lane.b32.xlu0 %v1779_v35, %s2227_s8 }
 0x272   : > { %p2159_p12 = pnand %p2158_p11, %p2294_p5  ;;  %p2166_p2 = por %p2165_p1, %p2164_p0 }
 0x274   : > { %p2160_p13 = pneg %p2159_p12 }
 0x275   : > { %1928 = vrot.lane.b32.xlu1 %v1925_v20, %s2227_s8  ;;  %1926 = vrot.lane.b32.xlu0 %v1911_v55, %s2227_s8  ;;  %s2078_s8 = sshll.u32 %s2277_s19, 10 }
 0x276   : > { %s4199_s19 = scalar_lea.hbm %s4257_s4, %s2078_s8  ;;  %p2167_p3 = pnand %p2166_p2, %p2160_p13 }
 0x2bb   : > { %v1649_v56 = vpop.permute.xlu1 %1648  ;;  %v1647_v9 = vpop.permute.xlu0 %1646 }
 0x2bf   : > { %v1449_v19 = vpop.permute.xlu1 %1448  ;;  %v1447_v49 = vpop.permute.xlu0 %1446 }
 0x2c0   : > { %v1933_v43 = vsel %vm792_vm3, %v1415_v28, %v1449_v19  ;;  %v1932_v50 = vsel %vm792_vm3, %v1401_v12, %v1447_v49 }
 0x2c3   : > { %v1581_v46 = vpop.permute.xlu1 %1580  ;;  %v1579_v2 = vpop.permute.xlu0 %1578 }
 0x2c4   : > { %v1939_v8 = vsel %vm792_vm3, %v1547_v53, %v1581_v46  ;;  %v1938_v29 = vsel %vm792_vm3, %v1533_v18, %v1579_v2 }
 0x2c7   : > { %v1483_v3 = vpop.permute.xlu1 %1482  ;;  %v1481_v34 = vpop.permute.xlu0 %1480 }
 0x2c8   : > { %v1935_v15 = vsel %vm858_vm5, %v1933_v43, %v1483_v3  ;;  %v1934_v44 = vsel %vm858_vm5, %v1932_v50, %v1481_v34 }
 0x2cb   : > { %v1615_v26 = vpop.permute.xlu1 %1614  ;;  %v1613_v14 = vpop.permute.xlu0 %1612 }
 0x2cc   : > { %v1941_v5 = vsel %vm858_vm5, %v1939_v8, %v1615_v26  ;;  %v1940_v57 = vsel %vm858_vm5, %v1938_v29, %v1613_v14 }
 0x2cd   : > { %v1943_v21 = vsel %vm924_vm7, %v1941_v5, %v1649_v56  ;;  %v1942_v1 = vsel %vm924_vm7, %v1940_v57, %v1647_v9 }
 0x2ce   : > { %1961 = vst [vmem:[%s4172_s28 + $0x28] sm:$0xff] %v1943_v21  ;;  %1957 = vst [vmem:[%s4172_s28 + $0x8] sm:$0xff] %v1942_v1 }
 0x2cf   : > { %v1517_v0 = vpop.permute.xlu1 %1516  ;;  %v1515_v33 = vpop.permute.xlu0 %1514 }
 0x2d0   : > { %v1937_v22 = vsel %vm924_vm7, %v1935_v15, %v1517_v0  ;;  %v1936_v16 = vsel %vm924_vm7, %v1934_v44, %v1515_v33 }
 0x2d1   : > { %1960 = vst [vmem:[%s4172_s28 + $0x20] sm:$0xff] %v1937_v22  ;;  %1956 = vst [vmem:[%s4172_s28] sm:$0xff] %v1936_v16 }
 0x2d3   : > { %v1729_v60 = vpop.permute.xlu1 %1728  ;;  %v1727_v54 = vpop.permute.xlu0 %1726 }
 0x2d4   : > { %v1945_v37 = vsel %vm792_vm3, %v1695_v32, %v1729_v60  ;;  %v1944_v6 = vsel %vm792_vm3, %v1681_v48, %v1727_v54 }
 0x2d7   : > { %v1861_v63 = vpop.permute.xlu1 %1860  ;;  %v1859_v27 = vpop.permute.xlu0 %1858 }
 0x2d8   : > { %v1951_v4 = vsel %vm792_vm3, %v4139_v31, %v1861_v63  ;;  %v1950_v40 = vsel %vm792_vm3, %v4143_v13, %v1859_v27 }
 0x2db   : > { %v1763_v30 = vpop.permute.xlu1 %1762  ;;  %v1761_v59 = vpop.permute.xlu0 %1760 }
 0x2dc   : > { %v1947_v42 = vsel %vm858_vm5, %v1945_v37, %v1763_v30  ;;  %v1946_v7 = vsel %vm858_vm5, %v1944_v6, %v1761_v59 }
 0x2df   : > { %v1895_v36 = vpop.permute.xlu1 %1894  ;;  %v1893_v38 = vpop.permute.xlu0 %1892 }
 0x2e0   : > { %v1953_v20 = vsel %vm858_vm5, %v1951_v4, %v1895_v36  ;;  %v1952_v55 = vsel %vm858_vm5, %v1950_v40, %v1893_v38 }
 0x2e3   : > { %v1797_v24 = vpop.permute.xlu1 %1796  ;;  %v1795_v10 = vpop.permute.xlu0 %1794 }
 0x2e4   : > { %v1949_v11 = vsel %vm924_vm7, %v1947_v42, %v1797_v24  ;;  %v1948_v62 = vsel %vm924_vm7, %v1946_v7, %v1795_v10 }
 0x2e5   : > { %1962 = vst [vmem:[%s4172_s28 + $0x30] sm:$0xff] %v1949_v11  ;;  %1958 = vst [vmem:[%s4172_s28 + $0x10] sm:$0xff] %v1948_v62 }
 0x2e7   : > { %v1929_v52 = vpop.permute.xlu1 %1928  ;;  %v1927_v61 = vpop.permute.xlu0 %1926 }
 0x2e8   : > { %v1955_v51 = vsel %vm924_vm7, %v1953_v20, %v1929_v52  ;;  %v1954_v45 = vsel %vm924_vm7, %v1952_v55, %v1927_v61 }
 0x2e9   : > { %1963 = vst [vmem:[%s4172_s28 + $0x38] sm:$0xff] %v1955_v51  ;;  %1959 = vst [vmem:[%s4172_s28 + $0x18] sm:$0xff] %v1954_v45 }
 0x2ea   : > { %2170 = shalt.err (!%p2167_p3)
}
 0x2eb   : > { %s2171_s29 = scalar_lea.hbm %s4199_s19, 1024  ;;  %s2175_s6 = scalar_lea.hbm %s4257_s4, 2048 }
 0x2ec   : > { %p2172_p4 = scmp.ne.s32.totalorder %s4199_s19, %s2171_s29  ;;  %p2176_p9 = scmp.lt.u32.totalorder %s4199_s19, %s4257_s4 }
 0x2ed   : > { %p2177_p10 = scmp.lt.u32.totalorder %s2175_s6, %s2171_s29  ;;  %p2179_p12 = scmp.lt.u32.totalorder %s2171_s29, %s4199_s19 }
 0x2ee   : > { %p2173_p7 = pnand %p2172_p4, %p2294_p5 }
 0x2ef   : > { %p2178_p11 = por %p2177_p10, %p2176_p9 }
 0x2f0   : > { %p2174_p8 = pneg %p2173_p7 }
 0x2f1   : > { %p2180_p13 = por %p2179_p12, %p2178_p11 }
 0x2f3   : > { %p2181_p0 = pnand %p2180_p13, %p2174_p8 }
 0x2f5   : > { %2184 = shalt.err (!%p2181_p0)
}
 0x2f6   : > { %s2230_s28 = smov 512  }
 0x2f7   : > { %2098 = dma.vmem_to_hbm [thread:$0]  (%p2294_p5), %s4203_s10, 1024, %s4199_s19, %s4211_s20, %s2230_s28, %s2230_s28, %s2223_s23  }
 0x2f8 PF: > { %p2104_p1 = scmp.ge.s32.totalorder %s2219_s18, 2  ;;  %s1993_s8 = sand.u32 1, %s2207_s15  }
 0x2f9   : > { %s1994_s12 = scalar_lea.sflag [#allocation3], %s1993_s8 }
 0x2fa   : > { %p2101_p2 = pnand %p2104_p1, %p2298_p6 }
 0x2fc   : > { %2202 = dma.done.wait (!%p2101_p2), %s1994_s12, 1024  }
 0x2fd   : > { %2204 = vsyncadd (!%p2101_p2), %s1994_s12, 4294966272  ;;  %p14_p3 = scmp.ge.s32.totalorder %s2281_s21, 4   ;;  %s4260_s15 = smov %s2211_s16 }
 0x2fe   : > { %s4261_s16 = smov %s2215_s17  ;;  %s4262_s17 = smov %s2292_s24 }
 0x2ff   : > { %s4263_s18 = smov %s2281_s21  ;;  %16 = sbr.rel (!%p14_p3) target bundleno = 3 (0x3), region = 71 }
 0x306   :  { %1999 = vsyncpa [#allocation3], 1 }
 0x307   :  { %2001 = vsyncpa [#allocation3 + $0x1], 1 }

</bundles_post_ra>
